<compile_context>
chip_gen: v6e
topology: v6e:2x2x1
jax: 0.10.0
libtpu: 0.0.40
codegen_flags: <defaults>
</compile_context>

<pallas_src>
import math
import functools

import jax
import jax.numpy as jnp
from jax import lax
from jax.experimental import pallas as pl
from jax.experimental.pallas import tpu as pltpu

# MXU input dtype (accumulation is always f32).
MXU_DTYPE = jnp.bfloat16

# Tile targets (largest aligned divisor <= target is chosen per call).
TILE_M = 512          # matmul rows per block
TILE_N = 512          # matmul output columns per block
TILE_K = 512          # reduction depth per block (full K used when K <= FULL_K_MAX)
FULL_K_MAX = 1024
TILE_Q = 256          # flash-attention query rows per block
TILE_KV = 512         # flash-attention KV rows per block


def _default_vmem_limit():
    """Per-generation scoped-VMEM limit: 3/4 of physical capacity, capped at 96 MiB.
    48 MiB fallback keeps v7x (64 MiB physical) safe if the query fails."""
    try:
        cap = pltpu.get_tpu_info().vmem_capacity_bytes
        return int(min(cap * 3 // 4, 96 * 1024 * 1024))
    except Exception:
        return 48 * 1024 * 1024


VMEM_LIMIT_BYTES = _default_vmem_limit()


def _pick_tile(dim, target, align):
    """Largest tile <= target that divides `dim` and is a multiple of `align`.
    Falls back to the full dimension only when no aligned divisor exists."""
    if dim <= target:
        return dim
    t = (target // align) * align
    while t >= align:
        if dim % t == 0:
            return t
        t -= align
    return dim  # pathological (e.g. prime) dim: whole axis in one block


def _gelu_exact(x):
    """GeLU in the module's exact-erf form: x * 0.5 * (1 + erf(x / 1.41421)).

    erf() is not a guaranteed Mosaic lowering, so it is evaluated with the
    Abramowitz-Stegun 7.1.26 approximation (max abs error ~1.5e-7); VPU ops + one EUP exp.
    """
    z = x * (1.0 / 1.41421)
    a = jnp.abs(z)
    t = 1.0 / (1.0 + 0.3275911 * a)
    poly = t * (0.254829592 + t * (-0.284496736 + t * (1.421413741
               + t * (-1.453152027 + t * 1.061405429))))
    erf_a = 1.0 - poly * jnp.exp(-a * a)
    erf_z = jnp.where(z < 0.0, -erf_a, erf_a)
    return x * 0.5 * (1.0 + erf_z)


# ----------------------------------------------------------------------------
# Kernel 1: tiled linear  y = act(x @ W + b), bf16 MXU inputs, f32 accumulation
# ----------------------------------------------------------------------------
def _linear_kernel(x_ref, w_ref, b_ref, o_ref, acc_ref, *, activation):
    @pl.when(pl.program_id(2) == 0)
    def _init():
        acc_ref[...] = jnp.zeros_like(acc_ref)

    acc_ref[...] += jnp.dot(x_ref[...], w_ref[...], preferred_element_type=jnp.float32)

    @pl.when(pl.program_id(2) == pl.num_programs(2) - 1)
    def _finalize():
        y = acc_ref[...] + b_ref[...]          # bias in f32
        if activation == "gelu":               # fused bias_gelu (trace-time branch)
            y = _gelu_exact(y)
        o_ref[...] = y.astype(o_ref.dtype)


def linear(x, w, b, *, activation=None, out_dtype=jnp.float32):
    """x: (M, K), w: (K, N) [stored transposed vs torch], b: (N,) f32 -> (M, N)."""
    M, K = x.shape
    Kw, N = w.shape
    assert K == Kw
    tm = _pick_tile(M, TILE_M, 8)
    tn = _pick_tile(N, TILE_N, 128)
    tk = K if K <= FULL_K_MAX else _pick_tile(K, TILE_K, 128)
    b2 = b.reshape(1, N).astype(jnp.float32)
    kernel = functools.partial(_linear_kernel, activation=activation)
    cost = pl.CostEstimate(
        flops=2 * M * N * K,
        transcendentals=(M * N if activation == "gelu" else 0),
        bytes_accessed=int(M * K * x.dtype.itemsize + K * N * w.dtype.itemsize
                           + N * 4 + M * N * jnp.dtype(out_dtype).itemsize),
    )
    return pl.pallas_call(
        kernel,
        out_shape=jax.ShapeDtypeStruct((M, N), out_dtype),
        grid_spec=pltpu.PrefetchScalarGridSpec(
            num_scalar_prefetch=0,
            grid=(M // tm, N // tn, K // tk),          # reduction (K) axis last
            in_specs=[
                pl.BlockSpec((tm, tk), lambda i, j, k: (i, k)),
                pl.BlockSpec((tk, tn), lambda i, j, k: (k, j)),
                pl.BlockSpec((1, tn), lambda i, j, k: (0, j)),   # k-invariant: resident
            ],
            out_specs=pl.BlockSpec((tm, tn), lambda i, j, k: (i, j)),
            scratch_shapes=[pltpu.VMEM((tm, tn), jnp.float32)],
        ),
        compiler_params=pltpu.CompilerParams(
            dimension_semantics=("parallel", "parallel", "arbitrary"),
            vmem_limit_bytes=VMEM_LIMIT_BYTES,
        ),
        cost_estimate=cost,
    )(x, w, b2)


# ----------------------------------------------------------------------------
# Kernel 2: fused linear + residual add + LayerNorm in the matmul epilogue
#           (used for the attention output projection and fc2)
# ----------------------------------------------------------------------------
def _linear_ln_kernel(x_ref, w_ref, b_ref, r_ref, g_ref, bb_ref, *refs,
                      eps, emit_bf16):
    if emit_bf16:
        o32_ref, o16_ref, acc_ref = refs
    else:
        (o32_ref, acc_ref), o16_ref = refs, None

    @pl.when(pl.program_id(1) == 0)
    def _init():
        acc_ref[...] = jnp.zeros_like(acc_ref)

    acc_ref[...] += jnp.dot(x_ref[...], w_ref[...], preferred_element_type=jnp.float32)

    @pl.when(pl.program_id(1) == pl.num_programs(1) - 1)
    def _finalize():
        # y = x@W + bias + residual   (dropout on the block output is identity in eval)
        y = acc_ref[...] + b_ref[...] + r_ref[...]
        u = jnp.mean(y, axis=-1, keepdims=True)
        yc = y - u
        var = jnp.mean(yc * yc, axis=-1, keepdims=True)        # biased var (BertLayerNorm)
        z = yc * lax.rsqrt(var + eps) * g_ref[...] + bb_ref[...]
        o32_ref[...] = z.astype(o32_ref.dtype)
        if emit_bf16:
            o16_ref[...] = z.astype(o16_ref.dtype)


def linear_add_layernorm(x, w, b, residual, gamma, beta, *, eps=1e-12, emit_bf16=False):
    """LayerNorm(x @ w + b + residual).  The whole output row (tn = N) lives in one block
    so mean/var/affine run inside the K-reduction finalize -> no extra HBM pass.
    Returns f32 output (and, if emit_bf16, a bf16 copy for the next MXU consumer)."""
    M, K = x.shape
    Kw, N = w.shape
    assert K == Kw and residual.shape == (M, N)
    tm = _pick_tile(M, TILE_M, 8)
    tk = K if K <= FULL_K_MAX else _pick_tile(K, TILE_K, 128)
    b2 = b.reshape(1, N).astype(jnp.float32)
    g2 = gamma.reshape(1, N).astype(jnp.float32)
    bb2 = beta.reshape(1, N).astype(jnp.float32)
    kernel = functools.partial(_linear_ln_kernel, eps=eps, emit_bf16=emit_bf16)

    out_shape = [jax.ShapeDtypeStruct((M, N), jnp.float32)]
    out_specs = [pl.BlockSpec((tm, N), lambda i, k: (i, 0))]
    if emit_bf16:
        out_shape.append(jax.ShapeDtypeStruct((M, N), MXU_DTYPE))
        out_specs.append(pl.BlockSpec((tm, N), lambda i, k: (i, 0)))

    cost = pl.CostEstimate(
        flops=2 * M * N * K + 10 * M * N,
        transcendentals=M,
        bytes_accessed=int(M * K * 2 + K * N * 2 + M * N * 4        # x, w, residual
                           + M * N * (4 + (2 if emit_bf16 else 0))  # outputs
                           + 3 * N * 4),
    )
    out = pl.pallas_call(
        kernel,
        out_shape=tuple(out_shape),
        grid_spec=pltpu.PrefetchScalarGridSpec(
            num_scalar_prefetch=0,
            grid=(M // tm, K // tk),                   # reduction (K) axis last
            in_specs=[
                pl.BlockSpec((tm, tk), lambda i, k: (i, k)),
                pl.BlockSpec((tk, N), lambda i, k: (k, 0)),
                pl.BlockSpec((1, N), lambda i, k: (0, 0)),       # bias (k-invariant)
                pl.BlockSpec((tm, N), lambda i, k: (i, 0)),      # residual (k-invariant)
                pl.BlockSpec((1, N), lambda i, k: (0, 0)),       # gamma
                pl.BlockSpec((1, N), lambda i, k: (0, 0)),       # beta
            ],
            out_specs=tuple(out_specs),
            scratch_shapes=[pltpu.VMEM((tm, N), jnp.float32)],
        ),
        compiler_params=pltpu.CompilerParams(
            dimension_semantics=("parallel", "arbitrary"),
            vmem_limit_bytes=VMEM_LIMIT_BYTES,
        ),
        cost_estimate=cost,
    )(x, w, b2, residual, g2, bb2)
    if emit_bf16:
        return out[0], out[1]
    return out[0]


# ----------------------------------------------------------------------------
# Kernel 3: flash-style multi-head attention (online softmax over KV blocks)
# ----------------------------------------------------------------------------
def _flash_attn_kernel(q_ref, k_ref, v_ref, mask_ref, o_ref, m_sc, l_sc, acc_sc, *, scale):
    ki = pl.program_id(3)

    @pl.when(ki == 0)
    def _init():
        m_sc[...] = jnp.full_like(m_sc, -jnp.inf)
        l_sc[...] = jnp.zeros_like(l_sc)
        acc_sc[...] = jnp.zeros_like(acc_sc)

    q = q_ref[0, 0]            # (tq, D) bf16
    k = k_ref[0, 0]            # (tkv, D) bf16
    v = v_ref[0, 0]            # (tkv, D) bf16
    mask = mask_ref[0, 0]      # (1, tkv) additive f32, broadcasts over query rows

    # scores: contract the head dims directly (no k.T transpose feeding the MXU)
    s = lax.dot_general(q, k, (((1,), (1,)), ((), ())),
                        preferred_element_type=jnp.float32)      # (tq, tkv)
    s = s * scale + mask        # scale-then-mask, like the torch module

    m_prev = m_sc[...]
    m_new = jnp.maximum(m_prev, jnp.max(s, axis=-1, keepdims=True))
    alpha = jnp.exp(m_prev - m_new)
    p = jnp.exp(s - m_new)
    l_sc[...] = alpha * l_sc[...] + jnp.sum(p, axis=-1, keepdims=True)
    acc_sc[...] = alpha * acc_sc[...] + jnp.dot(p.astype(v.dtype), v,
                                                preferred_element_type=jnp.float32)
    m_sc[...] = m_new
    # attention-prob dropout is identity in eval mode

    @pl.when(ki == pl.num_programs(3) - 1)
    def _finalize():
        o_ref[0, 0] = (acc_sc[...] *
                       pl.reciprocal(l_sc[...], approx=True)).astype(o_ref.dtype)


def flash_attention(q, k, v, attention_mask, *, out_dtype=MXU_DTYPE):
    """q, k, v: (B, nH, S, D) bf16; attention_mask: (B, 1, 1, S) additive f32.
    Returns context (B, nH, S, D).  VMEM is bounded by (tq, tkv) blocks regardless of S."""
    B, nH, S, D = q.shape
    tq = _pick_tile(S, TILE_Q, 8)
    tkv = _pick_tile(S, TILE_KV, 128)
    scale = 1.0 / math.sqrt(D)
    kernel = functools.partial(_flash_attn_kernel, scale=scale)
    cost = pl.CostEstimate(
        flops=4 * B * nH * S * S * D,
        transcendentals=B * nH * S * S,
        bytes_accessed=int(4 * B * nH * S * D * 2 + B * S * 4),
    )
    return pl.pallas_call(
        kernel,
        out_shape=jax.ShapeDtypeStruct((B, nH, S, D), out_dtype),
        grid_spec=pltpu.PrefetchScalarGridSpec(
            num_scalar_prefetch=0,
            grid=(B, nH, S // tq, S // tkv),           # KV (reduction) axis last
            in_specs=[
                pl.BlockSpec((1, 1, tq, D), lambda b, h, qi, ki: (b, h, qi, 0)),
                pl.BlockSpec((1, 1, tkv, D), lambda b, h, qi, ki: (b, h, ki, 0)),
                pl.BlockSpec((1, 1, tkv, D), lambda b, h, qi, ki: (b, h, ki, 0)),
                pl.BlockSpec((1, 1, 1, tkv), lambda b, h, qi, ki: (b, 0, 0, ki)),
            ],
            out_specs=pl.BlockSpec((1, 1, tq, D), lambda b, h, qi, ki: (b, h, qi, 0)),
            scratch_shapes=[
                pltpu.VMEM((tq, 1), jnp.float32),      # running max m
                pltpu.VMEM((tq, 1), jnp.float32),      # running denom l
                pltpu.VMEM((tq, D), jnp.float32),      # running context acc
            ],
        ),
        compiler_params=pltpu.CompilerParams(
            dimension_semantics=("parallel", "parallel", "parallel", "arbitrary"),
            vmem_limit_bytes=VMEM_LIMIT_BYTES,
        ),
        cost_estimate=cost,
    )(q, k, v, attention_mask)


# ----------------------------------------------------------------------------
# Parameters + full Block forward
# ----------------------------------------------------------------------------
class BlockParams:
    """Weights for the ELECTRA `Block`.  Weights are stored [in, out] (kernels compute
    x @ W + b) in the MXU dtype; biases / layernorm params stay f32."""

    def __init__(self, key, hidden_size, num_heads):
        self.hidden_size = hidden_size
        self.num_heads = num_heads
        self.head_dim = hidden_size // num_heads
        inter = 4 * hidden_size
        ks = jax.random.split(key, 12)
        std = 0.02

        def w(k, shape):
            return (jax.random.normal(k, shape, jnp.float32) * std).astype(MXU_DTYPE)

        def bvec(k, n):   # small nonzero biases so the bias path is actually exercised
            return 0.02 * jax.random.normal(k, (n,), jnp.float32)

        # fused Q|K|V projection: (H, 3H)
        self.w_qkv = w(ks[0], (hidden_size, 3 * hidden_size))
        self.b_qkv = bvec(ks[1], 3 * hidden_size)
        self.w_o = w(ks[2], (hidden_size, hidden_size))
        self.b_o = bvec(ks[3], hidden_size)
        self.w_fc1 = w(ks[4], (hidden_size, inter))
        self.b_fc1 = bvec(ks[5], inter)
        self.w_fc2 = w(ks[6], (inter, hidden_size))
        self.b_fc2 = bvec(ks[7], hidden_size)
        # layernorm affine params (perturbed from the 1/0 init so they are tested)
        self.ln1_g = 1.0 + 0.1 * jax.random.normal(ks[8], (hidden_size,), jnp.float32)
        self.ln1_b = 0.1 * jax.random.normal(ks[9], (hidden_size,), jnp.float32)
        self.ln2_g = 1.0 + 0.1 * jax.random.normal(ks[10], (hidden_size,), jnp.float32)
        self.ln2_b = 0.1 * jax.random.normal(ks[11], (hidden_size,), jnp.float32)


def block_forward(params, hidden_states, attention_mask):
    """Forward pass of `Block`.  hidden_states: (B, S, H); attention_mask: (B,1,1,S)."""
    # TODO(synk): training-mode dropout (on attention probs and block outputs) is not
    # implemented; this is the eval-mode (identity-dropout) forward.
    B, S, H = hidden_states.shape
    nH, D = params.num_heads, params.head_dim
    M = B * S
    x2d = hidden_states.reshape(M, H).astype(jnp.float32)   # f32 residual stream
    x_bf16 = x2d.astype(MXU_DTYPE)                           # single cast of the input

    # --- attention ---
    qkv = linear(x_bf16, params.w_qkv, params.b_qkv, out_dtype=MXU_DTYPE)  # (M, 3H)
    # split heads: (B, S, 3, nH, D) -> (3, B, nH, S, D) so each head is a 128-aligned block.
    # TODO(synk): this XLA transpose (and the context merge below) could be folded into the
    # QKV / attention output BlockSpecs (scatter/gather index_maps) to drop the HBM pass.
    qkv = qkv.reshape(B, S, 3, nH, D).transpose(2, 0, 3, 1, 4)
    q, k, v = qkv[0], qkv[1], qkv[2]
    ctx = flash_attention(q, k, v, attention_mask)           # (B, nH, S, D) bf16
    ctx2d = ctx.transpose(0, 2, 1, 3).reshape(M, H)          # (token, head*dim) bf16

    # output projection + residual + LayerNorm fused in the matmul epilogue;
    # emits f32 (residual stream) and bf16 (next MXU input) -> no wrapper astype pass.
    h1_f32, h1_bf16 = linear_add_layernorm(
        ctx2d, params.w_o, params.b_o, x2d, params.ln1_g, params.ln1_b, emit_bf16=True)

    # --- feed-forward ---
    ff1 = linear(h1_bf16, params.w_fc1, params.b_fc1,
                 activation="gelu", out_dtype=MXU_DTYPE)     # fused bias_gelu
    out = linear_add_layernorm(
        ff1, params.w_fc2, params.b_fc2, h1_f32, params.ln2_g, params.ln2_b,
        emit_bf16=False)                                     # residual + LN fused
    return out.reshape(B, S, H)


# ----------------------------------------------------------------------------
# Pure-JAX f32 reference (torch semantics) for sanity checking
# ----------------------------------------------------------------------------
def block_reference(params, hidden_states, attention_mask):
    f32 = jnp.float32
    B, S, H = hidden_states.shape
    nH, D = params.num_heads, params.head_dim

    def ln(x, g, b, eps=1e-12):
        u = x.mean(-1, keepdims=True)
        s = ((x - u) ** 2).mean(-1, keepdims=True)
        return (x - u) / jnp.sqrt(s + eps) * g + b

    x = hidden_states.astype(f32).reshape(B * S, H)
    qkv = x @ params.w_qkv.astype(f32) + params.b_qkv
    q, k, v = jnp.split(qkv, 3, axis=-1)

    def heads(t):
        return t.reshape(B, S, nH, D).transpose(0, 2, 1, 3)

    q, k, v = heads(q), heads(k), heads(v)
    scores = jnp.einsum("bhqd,bhkd->bhqk", q, k) / math.sqrt(D) + attention_mask
    p = jax.nn.softmax(scores, axis=-1)
    ctx = jnp.einsum("bhqk,bhkd->bhqd", p, v).transpose(0, 2, 1, 3).reshape(B * S, H)
    attn_out = ctx @ params.w_o.astype(f32) + params.b_o
    h1 = ln(attn_out + x, params.ln1_g, params.ln1_b)
    pre = h1 @ params.w_fc1.astype(f32) + params.b_fc1
    ff1 = pre * 0.5 * (1.0 + lax.erf(pre / 1.41421))     # exact-erf gelu, torch constant
    ff2 = ff1 @ params.w_fc2.astype(f32) + params.b_fc2
    out = ln(ff2 + h1, params.ln2_g, params.ln2_b)
    return out.reshape(B, S, H)


if __name__ == "__main__":
    B, S, H, nH = 2, 8, 32, 4

    key = jax.random.PRNGKey(0)
    kp, kx, km = jax.random.split(key, 3)

    params = BlockParams(kp, hidden_size=H, num_heads=nH)
    hidden_states = jax.random.normal(kx, (B, S, H), jnp.float32)
    # additive attention mask: 0 for kept tokens, -10000 for masked tokens
    keep = (jax.random.uniform(km, (B, 1, 1, S)) > 0.2).astype(jnp.float32)
    attention_mask = (1.0 - keep) * -10000.0

    fwd = jax.jit(lambda x, m: block_forward(params, x, m))
    out = jax.block_until_ready(fwd(hidden_states, attention_mask))

    ref = block_reference(params, hidden_states, attention_mask)
    assert out.shape == (B, S, H)
    # bf16 MXU inputs + approx reciprocal/rsqrt => ~1e-3-level agreement with f32 reference
    assert jnp.allclose(out, ref, atol=5e-3, rtol=5e-3), (
        "mismatch vs reference: max abs err = %e" % float(jnp.max(jnp.abs(out - ref))))

    print("KERNEL_OK")
</pallas_src>

<mosaic_0001>
module attributes {stable_mosaic.version = 11 : i64} {
  func.func @_linear_kernel(%arg0: i32, %arg1: i32, %arg2: i32, %arg3: memref<16x32xbf16, #tpu.memory_space<vmem>>, %arg4: memref<32x96xbf16, #tpu.memory_space<vmem>>, %arg5: memref<1x96xf32, #tpu.memory_space<vmem>>, %arg6: memref<16x96xbf16, #tpu.memory_space<vmem>>, %arg7: memref<16x96xf32, #tpu.memory_space<vmem>>) attributes {dimension_semantics = [#tpu.dimension_semantics<parallel>, #tpu.dimension_semantics<parallel>, #tpu.dimension_semantics<arbitrary>], iteration_bounds = array<i64: 1, 1, 1>, scalar_prefetch = 0 : i64, scratch_operands = 1 : i64, tpu.core_type = #tpu.core_type<tc>, window_params = [{transform_indices = @transform_0, window_bounds = array<i64: 16, 32>}, {transform_indices = @transform_1, window_bounds = array<i64: 32, 96>}, {transform_indices = @transform_2, window_bounds = array<i64: 1, 96>}, {transform_indices = @transform_3, window_bounds = array<i64: 16, 96>}]} {
    %c0_i32 = arith.constant 0 : i32
    %0 = arith.cmpi eq, %arg2, %c0_i32 : i32
    %1 = arith.extui %0 : i1 to i32
    %c0_i32_0 = arith.constant 0 : i32
    %2 = arith.cmpi ne, %1, %c0_i32_0 : i32
    scf.if %2 {
      %cst_10 = arith.constant 0.000000e+00 : f32
      %12 = vector.broadcast %cst_10 : f32 to vector<16x96xf32>
      %c0_11 = arith.constant 0 : index
      %c0_12 = arith.constant 0 : index
      %13 = vector.load %arg7[%c0_11, %c0_12] : memref<16x96xf32, #tpu.memory_space<vmem>>, vector<16x96xf32>
      tpu.vector_store %arg7[%c0_11, %c0_12], %12 {strides = array<i32>} : memref<16x96xf32, #tpu.memory_space<vmem>>, vector<16x96xf32>,
    } else {
    }
    %c0 = arith.constant 0 : index
    %c0_1 = arith.constant 0 : index
    %3 = vector.load %arg7[%c0, %c0_1] : memref<16x96xf32, #tpu.memory_space<vmem>>, vector<16x96xf32>
    %c0_2 = arith.constant 0 : index
    %c0_3 = arith.constant 0 : index
    %4 = vector.load %arg3[%c0_2, %c0_3] : memref<16x32xbf16, #tpu.memory_space<vmem>>, vector<16x32xbf16>
    %c0_4 = arith.constant 0 : index
    %c0_5 = arith.constant 0 : index
    %5 = vector.load %arg4[%c0_4, %c0_5] : memref<32x96xbf16, #tpu.memory_space<vmem>>, vector<32x96xbf16>
    %cst = arith.constant dense<0.000000e+00> : vector<16x96xf32>
    %6 = tpu.matmul %4, %5, %cst {dimension_numbers = #tpu.dot_dimension_numbers<[1], [0], [0], [1], [0, 0, 1, 1], [], []>} : vector<16x32xbf16>, vector<32x96xbf16>, vector<16x96xf32> -> vector<16x96xf32>
    %7 = arith.addf %3, %6 : vector<16x96xf32>
    %c0_6 = arith.constant 0 : index
    %c0_7 = arith.constant 0 : index
    %8 = vector.load %arg7[%c0_6, %c0_7] : memref<16x96xf32, #tpu.memory_space<vmem>>, vector<16x96xf32>
    tpu.vector_store %arg7[%c0_6, %c0_7], %7 {strides = array<i32>} : memref<16x96xf32, #tpu.memory_space<vmem>>, vector<16x96xf32>,
    %c0_i32_8 = arith.constant 0 : i32
    %9 = arith.cmpi eq, %arg2, %c0_i32_8 : i32
    %10 = arith.extui %9 : i1 to i32
    %c0_i32_9 = arith.constant 0 : i32
    %11 = arith.cmpi ne, %10, %c0_i32_9 : i32
    scf.if %11 {
      %c0_10 = arith.constant 0 : index
      %c0_11 = arith.constant 0 : index
      %12 = vector.load %arg7[%c0_10, %c0_11] : memref<16x96xf32, #tpu.memory_space<vmem>>, vector<16x96xf32>
      %c0_12 = arith.constant 0 : index
      %c0_13 = arith.constant 0 : index
      %13 = vector.load %arg5[%c0_12, %c0_13] : memref<1x96xf32, #tpu.memory_space<vmem>>, vector<1x96xf32>
      %14 = vector.broadcast %13 : vector<1x96xf32> to vector<16x96xf32>
      %15 = arith.addf %12, %14 : vector<16x96xf32>
      %16 = arith.truncf %15 : vector<16x96xf32> to vector<16x96xbf16>
      %c0_14 = arith.constant 0 : index
      %c0_15 = arith.constant 0 : index
      %17 = vector.load %arg6[%c0_14, %c0_15] : memref<16x96xbf16, #tpu.memory_space<vmem>>, vector<16x96xbf16>
      tpu.vector_store %arg6[%c0_14, %c0_15], %16 {strides = array<i32>} : memref<16x96xbf16, #tpu.memory_space<vmem>>, vector<16x96xbf16>,
    } else {
    }
    return
  }
  func.func @transform_0(%arg0: i32, %arg1: i32, %arg2: i32) -> (i32, i32) {
    %c0_i32 = arith.constant 0 : i32
    return %arg0, %arg2 : i32, i32
  }
  func.func @transform_1(%arg0: i32, %arg1: i32, %arg2: i32) -> (i32, i32) {
    %c0_i32 = arith.constant 0 : i32
    return %arg2, %arg1 : i32, i32
  }
  func.func @transform_2(%arg0: i32, %arg1: i32, %arg2: i32) -> (i32, i32) {
    %c0_i32 = arith.constant 0 : i32
    %c0_i32_0 = arith.constant 0 : i32
    return %c0_i32, %arg1 : i32, i32
  }
  func.func @transform_3(%arg0: i32, %arg1: i32, %arg2: i32) -> (i32, i32) {
    %c0_i32 = arith.constant 0 : i32
    return %arg0, %arg1 : i32, i32
  }
}

module attributes {stable_mosaic.version = 11 : i64} {
  func.func @_flash_attn_kernel(%arg0: i32, %arg1: i32, %arg2: i32, %arg3: i32, %arg4: memref<1x1x8x8xbf16, #tpu.memory_space<vmem>>, %arg5: memref<1x1x8x8xbf16, #tpu.memory_space<vmem>>, %arg6: memref<1x1x8x8xbf16, #tpu.memory_space<vmem>>, %arg7: memref<1x1x1x8xf32, #tpu.memory_space<vmem>>, %arg8: memref<1x1x8x8xbf16, #tpu.memory_space<vmem>>, %arg9: memref<8x1xf32, #tpu.memory_space<vmem>>, %arg10: memref<8x1xf32, #tpu.memory_space<vmem>>, %arg11: memref<8x8xf32, #tpu.memory_space<vmem>>) attributes {dimension_semantics = [#tpu.dimension_semantics<parallel>, #tpu.dimension_semantics<parallel>, #tpu.dimension_semantics<parallel>, #tpu.dimension_semantics<arbitrary>], iteration_bounds = array<i64: 2, 4, 1, 1>, scalar_prefetch = 0 : i64, scratch_operands = 3 : i64, tpu.core_type = #tpu.core_type<tc>, window_params = [{transform_indices = @transform_0, window_bounds = array<i64: 1, 1, 8, 8>}, {transform_indices = @transform_1, window_bounds = array<i64: 1, 1, 8, 8>}, {transform_indices = @transform_2, window_bounds = array<i64: 1, 1, 8, 8>}, {transform_indices = @transform_3, window_bounds = array<i64: 1, 1, 1, 8>}, {transform_indices = @transform_4, window_bounds = array<i64: 1, 1, 8, 8>}]} {
    %c0_i32 = arith.constant 0 : i32
    %0 = arith.cmpi eq, %arg3, %c0_i32 : i32
    %1 = arith.extui %0 : i1 to i32
    %c0_i32_0 = arith.constant 0 : i32
    %2 = arith.cmpi ne, %1, %c0_i32_0 : i32
    scf.if %2 {
      %cst_34 = arith.constant 0xFF800000 : f32
      %42 = vector.broadcast %cst_34 : f32 to vector<8x1xf32>
      %c0_35 = arith.constant 0 : index
      %c0_36 = arith.constant 0 : index
      %43 = vector.load %arg9[%c0_35, %c0_36] : memref<8x1xf32, #tpu.memory_space<vmem>>, vector<8x1xf32>
      tpu.vector_store %arg9[%c0_35, %c0_36], %42 {strides = array<i32>} : memref<8x1xf32, #tpu.memory_space<vmem>>, vector<8x1xf32>,
      %cst_37 = arith.constant 0.000000e+00 : f32
      %44 = vector.broadcast %cst_37 : f32 to vector<8x1xf32>
      %c0_38 = arith.constant 0 : index
      %c0_39 = arith.constant 0 : index
      %45 = vector.load %arg10[%c0_38, %c0_39] : memref<8x1xf32, #tpu.memory_space<vmem>>, vector<8x1xf32>
      tpu.vector_store %arg10[%c0_38, %c0_39], %44 {strides = array<i32>} : memref<8x1xf32, #tpu.memory_space<vmem>>, vector<8x1xf32>,
      %cst_40 = arith.constant 0.000000e+00 : f32
      %46 = vector.broadcast %cst_40 : f32 to vector<8x8xf32>
      %c0_41 = arith.constant 0 : index
      %c0_42 = arith.constant 0 : index
      %47 = vector.load %arg11[%c0_41, %c0_42] : memref<8x8xf32, #tpu.memory_space<vmem>>, vector<8x8xf32>
      tpu.vector_store %arg11[%c0_41, %c0_42], %46 {strides = array<i32>} : memref<8x8xf32, #tpu.memory_space<vmem>>, vector<8x8xf32>,
    } else {
    }
    %c0 = arith.constant 0 : index
    %c0_1 = arith.constant 0 : index
    %c0_2 = arith.constant 0 : index
    %c0_3 = arith.constant 0 : index
    %3 = vector.load %arg4[%c0, %c0_1, %c0_2, %c0_3] : memref<1x1x8x8xbf16, #tpu.memory_space<vmem>>, vector<1x1x8x8xbf16>
    %4 = vector.shape_cast %3 : vector<1x1x8x8xbf16> to vector<8x8xbf16>
    %c0_4 = arith.constant 0 : index
    %c0_5 = arith.constant 0 : index
    %c0_6 = arith.constant 0 : index
    %c0_7 = arith.constant 0 : index
    %5 = vector.load %arg5[%c0_4, %c0_5, %c0_6, %c0_7] : memref<1x1x8x8xbf16, #tpu.memory_space<vmem>>, vector<1x1x8x8xbf16>
    %6 = vector.shape_cast %5 : vector<1x1x8x8xbf16> to vector<8x8xbf16>
    %c0_8 = arith.constant 0 : index
    %c0_9 = arith.constant 0 : index
    %c0_10 = arith.constant 0 : index
    %c0_11 = arith.constant 0 : index
    %7 = vector.load %arg6[%c0_8, %c0_9, %c0_10, %c0_11] : memref<1x1x8x8xbf16, #tpu.memory_space<vmem>>, vector<1x1x8x8xbf16>
    %8 = vector.shape_cast %7 : vector<1x1x8x8xbf16> to vector<8x8xbf16>
    %c0_12 = arith.constant 0 : index
    %c0_13 = arith.constant 0 : index
    %c0_14 = arith.constant 0 : index
    %c0_15 = arith.constant 0 : index
    %9 = vector.load %arg7[%c0_12, %c0_13, %c0_14, %c0_15] : memref<1x1x1x8xf32, #tpu.memory_space<vmem>>, vector<1x1x1x8xf32>
    %10 = vector.shape_cast %9 : vector<1x1x1x8xf32> to vector<1x8xf32>
    %cst = arith.constant dense<0.000000e+00> : vector<8x8xf32>
    %11 = tpu.matmul %4, %6, %cst {dimension_numbers = #tpu.dot_dimension_numbers<[1], [1], [0], [0], [0, 0, 1, 0], [], []>} : vector<8x8xbf16>, vector<8x8xbf16>, vector<8x8xf32> -> vector<8x8xf32>
    %cst_16 = arith.constant 0.353553385 : f32
    %12 = vector.broadcast %cst_16 : f32 to vector<8x8xf32>
    %13 = arith.mulf %11, %12 : vector<8x8xf32>
    %14 = vector.broadcast %10 : vector<1x8xf32> to vector<8x8xf32>
    %15 = arith.addf %13, %14 : vector<8x8xf32>
    %c0_17 = arith.constant 0 : index
    %c0_18 = arith.constant 0 : index
    %16 = vector.load %arg9[%c0_17, %c0_18] : memref<8x1xf32, #tpu.memory_space<vmem>>, vector<8x1xf32>
    %cst_19 = arith.constant dense<0xFF800000> : vector<8xf32>
    %17 = vector.multi_reduction <maximumf>, %15, %cst_19 [1] : vector<8x8xf32> to vector<8xf32>
    %18 = vector.shape_cast %17 : vector<8xf32> to vector<8x1xf32>
    %19 = arith.maximumf %16, %18 : vector<8x1xf32>
    %20 = arith.subf %16, %19 : vector<8x1xf32>
    %21 = math.exp %20 : vector<8x1xf32>
    %22 = vector.broadcast %19 : vector<8x1xf32> to vector<8x8xf32>
    %23 = arith.subf %15, %22 : vector<8x8xf32>
    %24 = math.exp %23 : vector<8x8xf32>
    %c0_20 = arith.constant 0 : index
    %c0_21 = arith.constant 0 : index
    %25 = vector.load %arg10[%c0_20, %c0_21] : memref<8x1xf32, #tpu.memory_space<vmem>>, vector<8x1xf32>
    %26 = arith.mulf %21, %25 : vector<8x1xf32>
    %cst_22 = arith.constant dense<0.000000e+00> : vector<8xf32>
    %27 = vector.multi_reduction <add>, %24, %cst_22 [1] : vector<8x8xf32> to vector<8xf32>
    %28 = vector.shape_cast %27 : vector<8xf32> to vector<8x1xf32>
    %29 = arith.addf %26, %28 : vector<8x1xf32>
    %c0_23 = arith.constant 0 : index
    %c0_24 = arith.constant 0 : index
    %30 = vector.load %arg10[%c0_23, %c0_24] : memref<8x1xf32, #tpu.memory_space<vmem>>, vector<8x1xf32>
    tpu.vector_store %arg10[%c0_23, %c0_24], %29 {strides = array<i32>} : memref<8x1xf32, #tpu.memory_space<vmem>>, vector<8x1xf32>,
    %c0_25 = arith.constant 0 : index
    %c0_26 = arith.constant 0 : index
    %31 = vector.load %arg11[%c0_25, %c0_26] : memref<8x8xf32, #tpu.memory_space<vmem>>, vector<8x8xf32>
    %32 = vector.broadcast %21 : vector<8x1xf32> to vector<8x8xf32>
    %33 = arith.mulf %32, %31 : vector<8x8xf32>
    %34 = arith.truncf %24 : vector<8x8xf32> to vector<8x8xbf16>
    %cst_27 = arith.constant dense<0.000000e+00> : vector<8x8xf32>
    %35 = tpu.matmul %34, %8, %cst_27 {dimension_numbers = #tpu.dot_dimension_numbers<[1], [0], [0], [1], [0, 0, 1, 1], [], []>} : vector<8x8xbf16>, vector<8x8xbf16>, vector<8x8xf32> -> vector<8x8xf32>
    %36 = arith.addf %33, %35 : vector<8x8xf32>
    %c0_28 = arith.constant 0 : index
    %c0_29 = arith.constant 0 : index
    %37 = vector.load %arg11[%c0_28, %c0_29] : memref<8x8xf32, #tpu.memory_space<vmem>>, vector<8x8xf32>
    tpu.vector_store %arg11[%c0_28, %c0_29], %36 {strides = array<i32>} : memref<8x8xf32, #tpu.memory_space<vmem>>, vector<8x8xf32>,
    %c0_30 = arith.constant 0 : index
    %c0_31 = arith.constant 0 : index
    %38 = vector.load %arg9[%c0_30, %c0_31] : memref<8x1xf32, #tpu.memory_space<vmem>>, vector<8x1xf32>
    tpu.vector_store %arg9[%c0_30, %c0_31], %19 {strides = array<i32>} : memref<8x1xf32, #tpu.memory_space<vmem>>, vector<8x1xf32>,
    %c0_i32_32 = arith.constant 0 : i32
    %39 = arith.cmpi eq, %arg3, %c0_i32_32 : i32
    %40 = arith.extui %39 : i1 to i32
    %c0_i32_33 = arith.constant 0 : i32
    %41 = arith.cmpi ne, %40, %c0_i32_33 : i32
    scf.if %41 {
      %c0_34 = arith.constant 0 : index
      %c0_35 = arith.constant 0 : index
      %42 = vector.load %arg11[%c0_34, %c0_35] : memref<8x8xf32, #tpu.memory_space<vmem>>, vector<8x8xf32>
      %c0_36 = arith.constant 0 : index
      %c0_37 = arith.constant 0 : index
      %43 = vector.load %arg10[%c0_36, %c0_37] : memref<8x1xf32, #tpu.memory_space<vmem>>, vector<8x1xf32>
      %44 = tpu.reciprocal %43 {approx = true} : vector<8x1xf32> -> vector<8x1xf32>
      %45 = vector.broadcast %44 : vector<8x1xf32> to vector<8x8xf32>
      %46 = arith.mulf %42, %45 : vector<8x8xf32>
      %47 = arith.truncf %46 : vector<8x8xf32> to vector<8x8xbf16>
      %c0_38 = arith.constant 0 : index
      %c0_39 = arith.constant 0 : index
      %c0_40 = arith.constant 0 : index
      %c0_41 = arith.constant 0 : index
      %48 = vector.load %arg8[%c0_38, %c0_39, %c0_40, %c0_41] : memref<1x1x8x8xbf16, #tpu.memory_space<vmem>>, vector<1x1x8x8xbf16>
      %49 = vector.shape_cast %48 : vector<1x1x8x8xbf16> to vector<8x8xbf16>
      %50 = vector.shape_cast %47 : vector<8x8xbf16> to vector<1x1x8x8xbf16>
      tpu.vector_store %arg8[%c0_38, %c0_39, %c0_40, %c0_41], %50 {strides = array<i32>} : memref<1x1x8x8xbf16, #tpu.memory_space<vmem>>, vector<1x1x8x8xbf16>,
    } else {
    }
    return
  }
  func.func @transform_0(%arg0: i32, %arg1: i32, %arg2: i32, %arg3: i32) -> (i32, i32, i32, i32) {
    %c0_i32 = arith.constant 0 : i32
    %c0_i32_0 = arith.constant 0 : i32
    return %arg0, %arg1, %arg2, %c0_i32 : i32, i32, i32, i32
  }
  func.func @transform_1(%arg0: i32, %arg1: i32, %arg2: i32, %arg3: i32) -> (i32, i32, i32, i32) {
    %c0_i32 = arith.constant 0 : i32
    %c0_i32_0 = arith.constant 0 : i32
    return %arg0, %arg1, %arg3, %c0_i32 : i32, i32, i32, i32
  }
  func.func @transform_2(%arg0: i32, %arg1: i32, %arg2: i32, %arg3: i32) -> (i32, i32, i32, i32) {
    %c0_i32 = arith.constant 0 : i32
    %c0_i32_0 = arith.constant 0 : i32
    return %arg0, %arg1, %arg3, %c0_i32 : i32, i32, i32, i32
  }
  func.func @transform_3(%arg0: i32, %arg1: i32, %arg2: i32, %arg3: i32) -> (i32, i32, i32, i32) {
    %c0_i32 = arith.constant 0 : i32
    %c0_i32_0 = arith.constant 0 : i32
    %c0_i32_1 = arith.constant 0 : i32
    return %arg0, %c0_i32, %c0_i32_0, %arg3 : i32, i32, i32, i32
  }
  func.func @transform_4(%arg0: i32, %arg1: i32, %arg2: i32, %arg3: i32) -> (i32, i32, i32, i32) {
    %c0_i32 = arith.constant 0 : i32
    %c0_i32_0 = arith.constant 0 : i32
    return %arg0, %arg1, %arg2, %c0_i32 : i32, i32, i32, i32
  }
}

module attributes {stable_mosaic.version = 11 : i64} {
  func.func @_linear_ln_kernel(%arg0: i32, %arg1: i32, %arg2: memref<16x32xbf16, #tpu.memory_space<vmem>>, %arg3: memref<32x32xbf16, #tpu.memory_space<vmem>>, %arg4: memref<1x32xf32, #tpu.memory_space<vmem>>, %arg5: memref<16x32xf32, #tpu.memory_space<vmem>>, %arg6: memref<1x32xf32, #tpu.memory_space<vmem>>, %arg7: memref<1x32xf32, #tpu.memory_space<vmem>>, %arg8: memref<16x32xf32, #tpu.memory_space<vmem>>, %arg9: memref<16x32xbf16, #tpu.memory_space<vmem>>, %arg10: memref<16x32xf32, #tpu.memory_space<vmem>>) attributes {dimension_semantics = [#tpu.dimension_semantics<parallel>, #tpu.dimension_semantics<arbitrary>], iteration_bounds = array<i64: 1, 1>, scalar_prefetch = 0 : i64, scratch_operands = 1 : i64, tpu.core_type = #tpu.core_type<tc>, window_params = [{transform_indices = @transform_0, window_bounds = array<i64: 16, 32>}, {transform_indices = @transform_1, window_bounds = array<i64: 32, 32>}, {pipeline_mode = #tpu.pipeline_mode<synchronous>, transform_indices = @transform_2, window_bounds = array<i64: 1, 32>}, {transform_indices = @transform_3, window_bounds = array<i64: 16, 32>}, {pipeline_mode = #tpu.pipeline_mode<synchronous>, transform_indices = @transform_4, window_bounds = array<i64: 1, 32>}, {pipeline_mode = #tpu.pipeline_mode<synchronous>, transform_indices = @transform_5, window_bounds = array<i64: 1, 32>}, {transform_indices = @transform_6, window_bounds = array<i64: 16, 32>}, {transform_indices = @transform_7, window_bounds = array<i64: 16, 32>}]} {
    %c0_i32 = arith.constant 0 : i32
    %0 = arith.cmpi eq, %arg1, %c0_i32 : i32
    %1 = arith.extui %0 : i1 to i32
    %c0_i32_0 = arith.constant 0 : i32
    %2 = arith.cmpi ne, %1, %c0_i32_0 : i32
    scf.if %2 {
      %cst_10 = arith.constant 0.000000e+00 : f32
      %12 = vector.broadcast %cst_10 : f32 to vector<16x32xf32>
      %c0_11 = arith.constant 0 : index
      %c0_12 = arith.constant 0 : index
      %13 = vector.load %arg10[%c0_11, %c0_12] : memref<16x32xf32, #tpu.memory_space<vmem>>, vector<16x32xf32>
      tpu.vector_store %arg10[%c0_11, %c0_12], %12 {strides = array<i32>} : memref<16x32xf32, #tpu.memory_space<vmem>>, vector<16x32xf32>,
    } else {
    }
    %c0 = arith.constant 0 : index
    %c0_1 = arith.constant 0 : index
    %3 = vector.load %arg10[%c0, %c0_1] : memref<16x32xf32, #tpu.memory_space<vmem>>, vector<16x32xf32>
    %c0_2 = arith.constant 0 : index
    %c0_3 = arith.constant 0 : index
    %4 = vector.load %arg2[%c0_2, %c0_3] : memref<16x32xbf16, #tpu.memory_space<vmem>>, vector<16x32xbf16>
    %c0_4 = arith.constant 0 : index
    %c0_5 = arith.constant 0 : index
    %5 = vector.load %arg3[%c0_4, %c0_5] : memref<32x32xbf16, #tpu.memory_space<vmem>>, vector<32x32xbf16>
    %cst = arith.constant dense<0.000000e+00> : vector<16x32xf32>
    %6 = tpu.matmul %4, %5, %cst {dimension_numbers = #tpu.dot_dimension_numbers<[1], [0], [0], [1], [0, 0, 1, 1], [], []>} : vector<16x32xbf16>, vector<32x32xbf16>, vector<16x32xf32> -> vector<16x32xf32>
    %7 = arith.addf %3, %6 : vector<16x32xf32>
    %c0_6 = arith.constant 0 : index
    %c0_7 = arith.constant 0 : index
    %8 = vector.load %arg10[%c0_6, %c0_7] : memref<16x32xf32, #tpu.memory_space<vmem>>, vector<16x32xf32>
    tpu.vector_store %arg10[%c0_6, %c0_7], %7 {strides = array<i32>} : memref<16x32xf32, #tpu.memory_space<vmem>>, vector<16x32xf32>,
    %c0_i32_8 = arith.constant 0 : i32
    %9 = arith.cmpi eq, %arg1, %c0_i32_8 : i32
    %10 = arith.extui %9 : i1 to i32
    %c0_i32_9 = arith.constant 0 : i32
    %11 = arith.cmpi ne, %10, %c0_i32_9 : i32
    scf.if %11 {
      %c0_10 = arith.constant 0 : index
      %c0_11 = arith.constant 0 : index
      %12 = vector.load %arg10[%c0_10, %c0_11] : memref<16x32xf32, #tpu.memory_space<vmem>>, vector<16x32xf32>
      %c0_12 = arith.constant 0 : index
      %c0_13 = arith.constant 0 : index
      %13 = vector.load %arg4[%c0_12, %c0_13] : memref<1x32xf32, #tpu.memory_space<vmem>>, vector<1x32xf32>
      %14 = vector.broadcast %13 : vector<1x32xf32> to vector<16x32xf32>
      %15 = arith.addf %12, %14 : vector<16x32xf32>
      %c0_14 = arith.constant 0 : index
      %c0_15 = arith.constant 0 : index
      %16 = vector.load %arg5[%c0_14, %c0_15] : memref<16x32xf32, #tpu.memory_space<vmem>>, vector<16x32xf32>
      %17 = arith.addf %15, %16 : vector<16x32xf32>
      %cst_16 = arith.constant dense<0.000000e+00> : vector<16xf32>
      %18 = vector.multi_reduction <add>, %17, %cst_16 [1] : vector<16x32xf32> to vector<16xf32>
      %19 = vector.shape_cast %18 : vector<16xf32> to vector<16x1xf32>
      %cst_17 = arith.constant 3.200000e+01 : f32
      %20 = vector.broadcast %cst_17 : f32 to vector<16x1xf32>
      %21 = arith.divf %19, %20 : vector<16x1xf32>
      %22 = vector.broadcast %21 : vector<16x1xf32> to vector<16x32xf32>
      %23 = arith.subf %17, %22 : vector<16x32xf32>
      %24 = arith.mulf %23, %23 : vector<16x32xf32>
      %cst_18 = arith.constant dense<0.000000e+00> : vector<16xf32>
      %25 = vector.multi_reduction <add>, %24, %cst_18 [1] : vector<16x32xf32> to vector<16xf32>
      %26 = vector.shape_cast %25 : vector<16xf32> to vector<16x1xf32>
      %cst_19 = arith.constant 3.200000e+01 : f32
      %27 = vector.broadcast %cst_19 : f32 to vector<16x1xf32>
      %28 = arith.divf %26, %27 : vector<16x1xf32>
      %cst_20 = arith.constant 9.99999996E-13 : f32
      %29 = vector.broadcast %cst_20 : f32 to vector<16x1xf32>
      %30 = arith.addf %28, %29 : vector<16x1xf32>
      %31 = math.rsqrt %30 : vector<16x1xf32>
      %32 = vector.broadcast %31 : vector<16x1xf32> to vector<16x32xf32>
      %33 = arith.mulf %23, %32 : vector<16x32xf32>
      %c0_21 = arith.constant 0 : index
      %c0_22 = arith.constant 0 : index
      %34 = vector.load %arg6[%c0_21, %c0_22] : memref<1x32xf32, #tpu.memory_space<vmem>>, vector<1x32xf32>
      %35 = vector.broadcast %34 : vector<1x32xf32> to vector<16x32xf32>
      %36 = arith.mulf %33, %35 : vector<16x32xf32>
      %c0_23 = arith.constant 0 : index
      %c0_24 = arith.constant 0 : index
      %37 = vector.load %arg7[%c0_23, %c0_24] : memref<1x32xf32, #tpu.memory_space<vmem>>, vector<1x32xf32>
      %38 = vector.broadcast %37 : vector<1x32xf32> to vector<16x32xf32>
      %39 = arith.addf %36, %38 : vector<16x32xf32>
      %c0_25 = arith.constant 0 : index
      %c0_26 = arith.constant 0 : index
      %40 = vector.load %arg8[%c0_25, %c0_26] : memref<16x32xf32, #tpu.memory_space<vmem>>, vector<16x32xf32>
      tpu.vector_store %arg8[%c0_25, %c0_26], %39 {strides = array<i32>} : memref<16x32xf32, #tpu.memory_space<vmem>>, vector<16x32xf32>,
      %41 = arith.truncf %39 : vector<16x32xf32> to vector<16x32xbf16>
      %c0_27 = arith.constant 0 : index
      %c0_28 = arith.constant 0 : index
      %42 = vector.load %arg9[%c0_27, %c0_28] : memref<16x32xbf16, #tpu.memory_space<vmem>>, vector<16x32xbf16>
      tpu.vector_store %arg9[%c0_27, %c0_28], %41 {strides = array<i32>} : memref<16x32xbf16, #tpu.memory_space<vmem>>, vector<16x32xbf16>,
    } else {
    }
    return
  }
  func.func @transform_0(%arg0: i32, %arg1: i32) -> (i32, i32) {
    %c0_i32 = arith.constant 0 : i32
    return %arg0, %arg1 : i32, i32
  }
  func.func @transform_1(%arg0: i32, %arg1: i32) -> (i32, i32) {
    %c0_i32 = arith.constant 0 : i32
    %c0_i32_0 = arith.constant 0 : i32
    return %arg1, %c0_i32 : i32, i32
  }
  func.func @transform_2(%arg0: i32, %arg1: i32) -> (i32, i32) {
    %c0_i32 = arith.constant 0 : i32
    %c0_i32_0 = arith.constant 0 : i32
    %c0_i32_1 = arith.constant 0 : i32
    return %c0_i32, %c0_i32_0 : i32, i32
  }
  func.func @transform_3(%arg0: i32, %arg1: i32) -> (i32, i32) {
    %c0_i32 = arith.constant 0 : i32
    %c0_i32_0 = arith.constant 0 : i32
    return %arg0, %c0_i32 : i32, i32
  }
  func.func @transform_4(%arg0: i32, %arg1: i32) -> (i32, i32) {
    %c0_i32 = arith.constant 0 : i32
    %c0_i32_0 = arith.constant 0 : i32
    %c0_i32_1 = arith.constant 0 : i32
    return %c0_i32, %c0_i32_0 : i32, i32
  }
  func.func @transform_5(%arg0: i32, %arg1: i32) -> (i32, i32) {
    %c0_i32 = arith.constant 0 : i32
    %c0_i32_0 = arith.constant 0 : i32
    %c0_i32_1 = arith.constant 0 : i32
    return %c0_i32, %c0_i32_0 : i32, i32
  }
  func.func @transform_6(%arg0: i32, %arg1: i32) -> (i32, i32) {
    %c0_i32 = arith.constant 0 : i32
    %c0_i32_0 = arith.constant 0 : i32
    return %arg0, %c0_i32 : i32, i32
  }
  func.func @transform_7(%arg0: i32, %arg1: i32) -> (i32, i32) {
    %c0_i32 = arith.constant 0 : i32
    %c0_i32_0 = arith.constant 0 : i32
    return %arg0, %c0_i32 : i32, i32
  }
}

module attributes {stable_mosaic.version = 11 : i64} {
  func.func @_linear_kernel(%arg0: i32, %arg1: i32, %arg2: i32, %arg3: memref<16x32xbf16, #tpu.memory_space<vmem>>, %arg4: memref<32x128xbf16, #tpu.memory_space<vmem>>, %arg5: memref<1x128xf32, #tpu.memory_space<vmem>>, %arg6: memref<16x128xbf16, #tpu.memory_space<vmem>>, %arg7: memref<16x128xf32, #tpu.memory_space<vmem>>) attributes {dimension_semantics = [#tpu.dimension_semantics<parallel>, #tpu.dimension_semantics<parallel>, #tpu.dimension_semantics<arbitrary>], iteration_bounds = array<i64: 1, 1, 1>, scalar_prefetch = 0 : i64, scratch_operands = 1 : i64, tpu.core_type = #tpu.core_type<tc>, window_params = [{transform_indices = @transform_0, window_bounds = array<i64: 16, 32>}, {transform_indices = @transform_1, window_bounds = array<i64: 32, 128>}, {transform_indices = @transform_2, window_bounds = array<i64: 1, 128>}, {transform_indices = @transform_3, window_bounds = array<i64: 16, 128>}]} {
    %c0_i32 = arith.constant 0 : i32
    %0 = arith.cmpi eq, %arg2, %c0_i32 : i32
    %1 = arith.extui %0 : i1 to i32
    %c0_i32_0 = arith.constant 0 : i32
    %2 = arith.cmpi ne, %1, %c0_i32_0 : i32
    scf.if %2 {
      %cst_10 = arith.constant 0.000000e+00 : f32
      %12 = vector.broadcast %cst_10 : f32 to vector<16x128xf32>
      %c0_11 = arith.constant 0 : index
      %c0_12 = arith.constant 0 : index
      %13 = vector.load %arg7[%c0_11, %c0_12] : memref<16x128xf32, #tpu.memory_space<vmem>>, vector<16x128xf32>
      tpu.vector_store %arg7[%c0_11, %c0_12], %12 {strides = array<i32>} : memref<16x128xf32, #tpu.memory_space<vmem>>, vector<16x128xf32>,
    } else {
    }
    %c0 = arith.constant 0 : index
    %c0_1 = arith.constant 0 : index
    %3 = vector.load %arg7[%c0, %c0_1] : memref<16x128xf32, #tpu.memory_space<vmem>>, vector<16x128xf32>
    %c0_2 = arith.constant 0 : index
    %c0_3 = arith.constant 0 : index
    %4 = vector.load %arg3[%c0_2, %c0_3] : memref<16x32xbf16, #tpu.memory_space<vmem>>, vector<16x32xbf16>
    %c0_4 = arith.constant 0 : index
    %c0_5 = arith.constant 0 : index
    %5 = vector.load %arg4[%c0_4, %c0_5] : memref<32x128xbf16, #tpu.memory_space<vmem>>, vector<32x128xbf16>
    %cst = arith.constant dense<0.000000e+00> : vector<16x128xf32>
    %6 = tpu.matmul %4, %5, %cst {dimension_numbers = #tpu.dot_dimension_numbers<[1], [0], [0], [1], [0, 0, 1, 1], [], []>} : vector<16x32xbf16>, vector<32x128xbf16>, vector<16x128xf32> -> vector<16x128xf32>
    %7 = arith.addf %3, %6 : vector<16x128xf32>
    %c0_6 = arith.constant 0 : index
    %c0_7 = arith.constant 0 : index
    %8 = vector.load %arg7[%c0_6, %c0_7] : memref<16x128xf32, #tpu.memory_space<vmem>>, vector<16x128xf32>
    tpu.vector_store %arg7[%c0_6, %c0_7], %7 {strides = array<i32>} : memref<16x128xf32, #tpu.memory_space<vmem>>, vector<16x128xf32>,
    %c0_i32_8 = arith.constant 0 : i32
    %9 = arith.cmpi eq, %arg2, %c0_i32_8 : i32
    %10 = arith.extui %9 : i1 to i32
    %c0_i32_9 = arith.constant 0 : i32
    %11 = arith.cmpi ne, %10, %c0_i32_9 : i32
    scf.if %11 {
      %c0_10 = arith.constant 0 : index
      %c0_11 = arith.constant 0 : index
      %12 = vector.load %arg7[%c0_10, %c0_11] : memref<16x128xf32, #tpu.memory_space<vmem>>, vector<16x128xf32>
      %c0_12 = arith.constant 0 : index
      %c0_13 = arith.constant 0 : index
      %13 = vector.load %arg5[%c0_12, %c0_13] : memref<1x128xf32, #tpu.memory_space<vmem>>, vector<1x128xf32>
      %14 = vector.broadcast %13 : vector<1x128xf32> to vector<16x128xf32>
      %15 = arith.addf %12, %14 : vector<16x128xf32>
      %cst_14 = arith.constant 0.707108557 : f32
      %16 = vector.broadcast %cst_14 : f32 to vector<16x128xf32>
      %17 = arith.mulf %15, %16 : vector<16x128xf32>
      %18 = math.absf %17 : vector<16x128xf32>
      %cst_15 = arith.constant 0.327591091 : f32
      %19 = vector.broadcast %cst_15 : f32 to vector<16x128xf32>
      %20 = arith.mulf %19, %18 : vector<16x128xf32>
      %cst_16 = arith.constant 1.000000e+00 : f32
      %21 = vector.broadcast %cst_16 : f32 to vector<16x128xf32>
      %22 = arith.addf %21, %20 : vector<16x128xf32>
      %cst_17 = arith.constant 1.000000e+00 : f32
      %23 = vector.broadcast %cst_17 : f32 to vector<16x128xf32>
      %24 = arith.divf %23, %22 : vector<16x128xf32>
      %cst_18 = arith.constant 1.06140542 : f32
      %25 = vector.broadcast %cst_18 : f32 to vector<16x128xf32>
      %26 = arith.mulf %24, %25 : vector<16x128xf32>
      %cst_19 = arith.constant -1.45315206 : f32
      %27 = vector.broadcast %cst_19 : f32 to vector<16x128xf32>
      %28 = arith.addf %27, %26 : vector<16x128xf32>
      %29 = arith.mulf %24, %28 : vector<16x128xf32>
      %cst_20 = arith.constant 1.42141378 : f32
      %30 = vector.broadcast %cst_20 : f32 to vector<16x128xf32>
      %31 = arith.addf %30, %29 : vector<16x128xf32>
      %32 = arith.mulf %24, %31 : vector<16x128xf32>
      %cst_21 = arith.constant -0.284496725 : f32
      %33 = vector.broadcast %cst_21 : f32 to vector<16x128xf32>
      %34 = arith.addf %33, %32 : vector<16x128xf32>
      %35 = arith.mulf %24, %34 : vector<16x128xf32>
      %cst_22 = arith.constant 0.254829586 : f32
      %36 = vector.broadcast %cst_22 : f32 to vector<16x128xf32>
      %37 = arith.addf %36, %35 : vector<16x128xf32>
      %38 = arith.mulf %24, %37 : vector<16x128xf32>
      %cst_23 = arith.constant 0.000000e+00 : f32
      %39 = vector.broadcast %cst_23 : f32 to vector<16x128xf32>
      %40 = arith.subf %39, %18 : vector<16x128xf32>
      %41 = arith.mulf %40, %18 : vector<16x128xf32>
      %42 = math.exp %41 : vector<16x128xf32>
      %43 = arith.mulf %38, %42 : vector<16x128xf32>
      %cst_24 = arith.constant 1.000000e+00 : f32
      %44 = vector.broadcast %cst_24 : f32 to vector<16x128xf32>
      %45 = arith.subf %44, %43 : vector<16x128xf32>
      %cst_25 = arith.constant 0.000000e+00 : f32
      %46 = vector.broadcast %cst_25 : f32 to vector<16x128xf32>
      %47 = arith.cmpf olt, %17, %46 : vector<16x128xf32>
      %cst_26 = arith.constant 0.000000e+00 : f32
      %48 = vector.broadcast %cst_26 : f32 to vector<16x128xf32>
      %49 = arith.subf %48, %45 : vector<16x128xf32>
      %50 = arith.select %47, %49, %45 : vector<16x128xi1>, vector<16x128xf32>
      %cst_27 = arith.constant 5.000000e-01 : f32
      %51 = vector.broadcast %cst_27 : f32 to vector<16x128xf32>
      %52 = arith.mulf %15, %51 : vector<16x128xf32>
      %cst_28 = arith.constant 1.000000e+00 : f32
      %53 = vector.broadcast %cst_28 : f32 to vector<16x128xf32>
      %54 = arith.addf %53, %50 : vector<16x128xf32>
      %55 = arith.mulf %52, %54 : vector<16x128xf32>
      %56 = arith.truncf %55 : vector<16x128xf32> to vector<16x128xbf16>
      %c0_29 = arith.constant 0 : index
      %c0_30 = arith.constant 0 : index
      %57 = vector.load %arg6[%c0_29, %c0_30] : memref<16x128xbf16, #tpu.memory_space<vmem>>, vector<16x128xbf16>
      tpu.vector_store %arg6[%c0_29, %c0_30], %56 {strides = array<i32>} : memref<16x128xbf16, #tpu.memory_space<vmem>>, vector<16x128xbf16>,
    } else {
    }
    return
  }
  func.func @transform_0(%arg0: i32, %arg1: i32, %arg2: i32) -> (i32, i32) {
    %c0_i32 = arith.constant 0 : i32
    return %arg0, %arg2 : i32, i32
  }
  func.func @transform_1(%arg0: i32, %arg1: i32, %arg2: i32) -> (i32, i32) {
    %c0_i32 = arith.constant 0 : i32
    return %arg2, %arg1 : i32, i32
  }
  func.func @transform_2(%arg0: i32, %arg1: i32, %arg2: i32) -> (i32, i32) {
    %c0_i32 = arith.constant 0 : i32
    %c0_i32_0 = arith.constant 0 : i32
    return %c0_i32, %arg1 : i32, i32
  }
  func.func @transform_3(%arg0: i32, %arg1: i32, %arg2: i32) -> (i32, i32) {
    %c0_i32 = arith.constant 0 : i32
    return %arg0, %arg1 : i32, i32
  }
}

module attributes {stable_mosaic.version = 11 : i64} {
  func.func @_linear_ln_kernel(%arg0: i32, %arg1: i32, %arg2: memref<16x128xbf16, #tpu.memory_space<vmem>>, %arg3: memref<128x32xbf16, #tpu.memory_space<vmem>>, %arg4: memref<1x32xf32, #tpu.memory_space<vmem>>, %arg5: memref<16x32xf32, #tpu.memory_space<vmem>>, %arg6: memref<1x32xf32, #tpu.memory_space<vmem>>, %arg7: memref<1x32xf32, #tpu.memory_space<vmem>>, %arg8: memref<16x32xf32, #tpu.memory_space<vmem>>, %arg9: memref<16x32xf32, #tpu.memory_space<vmem>>) attributes {dimension_semantics = [#tpu.dimension_semantics<parallel>, #tpu.dimension_semantics<arbitrary>], iteration_bounds = array<i64: 1, 1>, scalar_prefetch = 0 : i64, scratch_operands = 1 : i64, tpu.core_type = #tpu.core_type<tc>, window_params = [{transform_indices = @transform_0, window_bounds = array<i64: 16, 128>}, {transform_indices = @transform_1, window_bounds = array<i64: 128, 32>}, {pipeline_mode = #tpu.pipeline_mode<synchronous>, transform_indices = @transform_2, window_bounds = array<i64: 1, 32>}, {transform_indices = @transform_3, window_bounds = array<i64: 16, 32>}, {pipeline_mode = #tpu.pipeline_mode<synchronous>, transform_indices = @transform_4, window_bounds = array<i64: 1, 32>}, {pipeline_mode = #tpu.pipeline_mode<synchronous>, transform_indices = @transform_5, window_bounds = array<i64: 1, 32>}, {transform_indices = @transform_6, window_bounds = array<i64: 16, 32>}]} {
    %c0_i32 = arith.constant 0 : i32
    %0 = arith.cmpi eq, %arg1, %c0_i32 : i32
    %1 = arith.extui %0 : i1 to i32
    %c0_i32_0 = arith.constant 0 : i32
    %2 = arith.cmpi ne, %1, %c0_i32_0 : i32
    scf.if %2 {
      %cst_10 = arith.constant 0.000000e+00 : f32
      %12 = vector.broadcast %cst_10 : f32 to vector<16x32xf32>
      %c0_11 = arith.constant 0 : index
      %c0_12 = arith.constant 0 : index
      %13 = vector.load %arg9[%c0_11, %c0_12] : memref<16x32xf32, #tpu.memory_space<vmem>>, vector<16x32xf32>
      tpu.vector_store %arg9[%c0_11, %c0_12], %12 {strides = array<i32>} : memref<16x32xf32, #tpu.memory_space<vmem>>, vector<16x32xf32>,
    } else {
    }
    %c0 = arith.constant 0 : index
    %c0_1 = arith.constant 0 : index
    %3 = vector.load %arg9[%c0, %c0_1] : memref<16x32xf32, #tpu.memory_space<vmem>>, vector<16x32xf32>
    %c0_2 = arith.constant 0 : index
    %c0_3 = arith.constant 0 : index
    %4 = vector.load %arg2[%c0_2, %c0_3] : memref<16x128xbf16, #tpu.memory_space<vmem>>, vector<16x128xbf16>
    %c0_4 = arith.constant 0 : index
    %c0_5 = arith.constant 0 : index
    %5 = vector.load %arg3[%c0_4, %c0_5] : memref<128x32xbf16, #tpu.memory_space<vmem>>, vector<128x32xbf16>
    %cst = arith.constant dense<0.000000e+00> : vector<16x32xf32>
    %6 = tpu.matmul %4, %5, %cst {dimension_numbers = #tpu.dot_dimension_numbers<[1], [0], [0], [1], [0, 0, 1, 1], [], []>} : vector<16x128xbf16>, vector<128x32xbf16>, vector<16x32xf32> -> vector<16x32xf32>
    %7 = arith.addf %3, %6 : vector<16x32xf32>
    %c0_6 = arith.constant 0 : index
    %c0_7 = arith.constant 0 : index
    %8 = vector.load %arg9[%c0_6, %c0_7] : memref<16x32xf32, #tpu.memory_space<vmem>>, vector<16x32xf32>
    tpu.vector_store %arg9[%c0_6, %c0_7], %7 {strides = array<i32>} : memref<16x32xf32, #tpu.memory_space<vmem>>, vector<16x32xf32>,
    %c0_i32_8 = arith.constant 0 : i32
    %9 = arith.cmpi eq, %arg1, %c0_i32_8 : i32
    %10 = arith.extui %9 : i1 to i32
    %c0_i32_9 = arith.constant 0 : i32
    %11 = arith.cmpi ne, %10, %c0_i32_9 : i32
    scf.if %11 {
      %c0_10 = arith.constant 0 : index
      %c0_11 = arith.constant 0 : index
      %12 = vector.load %arg9[%c0_10, %c0_11] : memref<16x32xf32, #tpu.memory_space<vmem>>, vector<16x32xf32>
      %c0_12 = arith.constant 0 : index
      %c0_13 = arith.constant 0 : index
      %13 = vector.load %arg4[%c0_12, %c0_13] : memref<1x32xf32, #tpu.memory_space<vmem>>, vector<1x32xf32>
      %14 = vector.broadcast %13 : vector<1x32xf32> to vector<16x32xf32>
      %15 = arith.addf %12, %14 : vector<16x32xf32>
      %c0_14 = arith.constant 0 : index
      %c0_15 = arith.constant 0 : index
      %16 = vector.load %arg5[%c0_14, %c0_15] : memref<16x32xf32, #tpu.memory_space<vmem>>, vector<16x32xf32>
      %17 = arith.addf %15, %16 : vector<16x32xf32>
      %cst_16 = arith.constant dense<0.000000e+00> : vector<16xf32>
      %18 = vector.multi_reduction <add>, %17, %cst_16 [1] : vector<16x32xf32> to vector<16xf32>
      %19 = vector.shape_cast %18 : vector<16xf32> to vector<16x1xf32>
      %cst_17 = arith.constant 3.200000e+01 : f32
      %20 = vector.broadcast %cst_17 : f32 to vector<16x1xf32>
      %21 = arith.divf %19, %20 : vector<16x1xf32>
      %22 = vector.broadcast %21 : vector<16x1xf32> to vector<16x32xf32>
      %23 = arith.subf %17, %22 : vector<16x32xf32>
      %24 = arith.mulf %23, %23 : vector<16x32xf32>
      %cst_18 = arith.constant dense<0.000000e+00> : vector<16xf32>
      %25 = vector.multi_reduction <add>, %24, %cst_18 [1] : vector<16x32xf32> to vector<16xf32>
      %26 = vector.shape_cast %25 : vector<16xf32> to vector<16x1xf32>
      %cst_19 = arith.constant 3.200000e+01 : f32
      %27 = vector.broadcast %cst_19 : f32 to vector<16x1xf32>
      %28 = arith.divf %26, %27 : vector<16x1xf32>
      %cst_20 = arith.constant 9.99999996E-13 : f32
      %29 = vector.broadcast %cst_20 : f32 to vector<16x1xf32>
      %30 = arith.addf %28, %29 : vector<16x1xf32>
      %31 = math.rsqrt %30 : vector<16x1xf32>
      %32 = vector.broadcast %31 : vector<16x1xf32> to vector<16x32xf32>
      %33 = arith.mulf %23, %32 : vector<16x32xf32>
      %c0_21 = arith.constant 0 : index
      %c0_22 = arith.constant 0 : index
      %34 = vector.load %arg6[%c0_21, %c0_22] : memref<1x32xf32, #tpu.memory_space<vmem>>, vector<1x32xf32>
      %35 = vector.broadcast %34 : vector<1x32xf32> to vector<16x32xf32>
      %36 = arith.mulf %33, %35 : vector<16x32xf32>
      %c0_23 = arith.constant 0 : index
      %c0_24 = arith.constant 0 : index
      %37 = vector.load %arg7[%c0_23, %c0_24] : memref<1x32xf32, #tpu.memory_space<vmem>>, vector<1x32xf32>
      %38 = vector.broadcast %37 : vector<1x32xf32> to vector<16x32xf32>
      %39 = arith.addf %36, %38 : vector<16x32xf32>
      %c0_25 = arith.constant 0 : index
      %c0_26 = arith.constant 0 : index
      %40 = vector.load %arg8[%c0_25, %c0_26] : memref<16x32xf32, #tpu.memory_space<vmem>>, vector<16x32xf32>
      tpu.vector_store %arg8[%c0_25, %c0_26], %39 {strides = array<i32>} : memref<16x32xf32, #tpu.memory_space<vmem>>, vector<16x32xf32>,
    } else {
    }
    return
  }
  func.func @transform_0(%arg0: i32, %arg1: i32) -> (i32, i32) {
    %c0_i32 = arith.constant 0 : i32
    return %arg0, %arg1 : i32, i32
  }
  func.func @transform_1(%arg0: i32, %arg1: i32) -> (i32, i32) {
    %c0_i32 = arith.constant 0 : i32
    %c0_i32_0 = arith.constant 0 : i32
    return %arg1, %c0_i32 : i32, i32
  }
  func.func @transform_2(%arg0: i32, %arg1: i32) -> (i32, i32) {
    %c0_i32 = arith.constant 0 : i32
    %c0_i32_0 = arith.constant 0 : i32
    %c0_i32_1 = arith.constant 0 : i32
    return %c0_i32, %c0_i32_0 : i32, i32
  }
  func.func @transform_3(%arg0: i32, %arg1: i32) -> (i32, i32) {
    %c0_i32 = arith.constant 0 : i32
    %c0_i32_0 = arith.constant 0 : i32
    return %arg0, %c0_i32 : i32, i32
  }
  func.func @transform_4(%arg0: i32, %arg1: i32) -> (i32, i32) {
    %c0_i32 = arith.constant 0 : i32
    %c0_i32_0 = arith.constant 0 : i32
    %c0_i32_1 = arith.constant 0 : i32
    return %c0_i32, %c0_i32_0 : i32, i32
  }
  func.func @transform_5(%arg0: i32, %arg1: i32) -> (i32, i32) {
    %c0_i32 = arith.constant 0 : i32
    %c0_i32_0 = arith.constant 0 : i32
    %c0_i32_1 = arith.constant 0 : i32
    return %c0_i32, %c0_i32_0 : i32, i32
  }
  func.func @transform_6(%arg0: i32, %arg1: i32) -> (i32, i32) {
    %c0_i32 = arith.constant 0 : i32
    %c0_i32_0 = arith.constant 0 : i32
    return %arg0, %c0_i32 : i32, i32
  }
}

</mosaic_0001>

<bundles_post_ra>
// kernel: _lambda_.5
= control target key start
LH: loop header
LB: loop body
LE: loop exit
PB: predicated region body
PF: predicated region fallthrough
CT: control target
= control target key end

     0   :  { %vm19_vm0 = vcmask 785408   ;;  %v151_v0 = vmov 0.0   ;;  %vm152_vm1 = vmmov 0   ;;  %vm47_vm2 = vcmask 261120   ;;  %s195_s1 = inlined_call_operand.vmem [shape: bf16[32,96], index: 1, kind: input, shape index: {}]   ;;  %s196_s0 = inlined_call_operand.vmem [shape: bf16[16,32], index: 0, kind: input, shape index: {}]   ;;  %s197_s2 = inlined_call_operand.vmem [shape: f32[1,96], index: 2, kind: input, shape index: {}]   ;;  %s198_s3 = inlined_call_operand.vmem [shape: bf16[16,96], index: 3, kind: output, shape index: {}]  }
   0x1   :  { %138 = vmatprep.subr.bf16.mxu0 %v151_v0  ;;  %v148_v1 = vld [vmem:[%s195_s1 + $0x8] sm:$0xff]   ;;  %142 = vmatprep.mubr.msk.bf16.mxu0 %vm152_vm1, %v151_v0  ;;  %20 = vst.msk [vmem:[#allocation2] sm:$0xff] %vm19_vm0, %v151_v0  ;;  %21 = vst.msk [vmem:[#allocation2 + $0x8] sm:$0xff] %vm19_vm0, %v151_v0  ;;  %v149_v2 = vld [vmem:[%s195_s1] sm:$0xff]   ;;  %vm119_vm3 = vcmask 781312  }
   0x2   :  { %139 = vmatpush3.bf16.msra.mxu0 %v148_v1  ;;  %v150_v3 = vld [vmem:[%s196_s0] sm:$0xff]  }
   0x3   :  { %140 = vmatprep.subr.bf16.mxu0 %v151_v0  ;;  %v130_v12 = vld [vmem:[%s197_s2] ss:$0 sm:$0xff] }
   0x6   :  { %141 = vmatpush3.bf16.msra.mxu0 %v149_v2 }
   0x8   :  { %v22_v4 = vld [vmem:[#allocation2] sm:$0xff]  ;;  %v23_v8 = vld [vmem:[#allocation2 + $0x8] sm:$0xff] }
   0x9   :  { %143 = vmatmul.mubr.msk.bf16.vlgmr.msra.gmra.mxu0 %vm47_vm2, %v150_v3 }
  0xc9   :  { %v85_v5 = vpop.f32.mrf.mxu0 }
  0xca   :  { %v92_v6 = vadd.f32 %v85_v5, %v22_v4 }
  0xcb   :  { %v144_v7 = vpop.f32.mrf.mxu0 }
  0xcc   :  { %95 = vst.msk [vmem:[#allocation2] sm:$0xff] %vm19_vm0, %v92_v6 }
  0xcd   :  { %v88_v9 = vpop.f32.mrf.mxu0 }
  0xce   :  { %v93_v10 = vadd.f32 %v88_v9, %v23_v8 }
  0xcf   :  { %v145_v11 = vpop.f32.mrf.mxu0 }
  0xd0   :  { %96 = vst.msk [vmem:[#allocation2 + $0x8] sm:$0xff] %vm19_vm0, %v93_v10 }
  0xd3   :  { %v100_v13 = vld [vmem:[#allocation2] sm:$0xff] }
  0xd4   :  { %v109_v14 = vadd.f32 %v130_v12, %v100_v13 }
  0xd6   :  { %v133_v15 = vpack.c.bf16 %v109_v14, %v109_v14 }
  0xd7   :  { %v101_v16 = vld [vmem:[#allocation2 + $0x8] sm:$0xff] }
  0xd8   :  { %120 = vst.msk [vmem:[%s198_s3] sm:$0xf] %vm119_vm3, %v133_v15  ;;  %v110_v17 = vadd.f32 %v130_v12, %v101_v16 }
  0xda   :  { %v134_v18 = vpack.c.bf16 %v110_v17, %v110_v17 }
  0xdc   :  { %121 = vst.msk [vmem:[%s198_s3 + $0x4] sm:$0xf] %vm119_vm3, %v134_v18 }

// kernel: _lambda_.6
= control target key start
LH: loop header
LB: loop body
LE: loop exit
PB: predicated region body
PF: predicated region fallthrough
CT: control target
= control target key end

     0   :  { %s851_s15 = smov 0   ;;  %s853_s16 = smov 0   ;;  %s928_s0 = inlined_call_operand.vmem [shape: bf16[2,4,8,8], index: 0, kind: input, shape index: {}]   ;;  %s929_s1 = inlined_call_operand.vmem [shape: bf16[2,4,8,8], index: 1, kind: input, shape index: {}]   ;;  %s930_s2 = inlined_call_operand.vmem [shape: bf16[2,4,8,8], index: 2, kind: input, shape index: {}]   ;;  %s931_s3 = inlined_call_operand.vmem [shape: f32[2,1,1,8], index: 3, kind: input, shape index: {}]   ;;  %s932_s4 = inlined_call_operand.vmem [shape: bf16[2,4,8,8], index: 4, kind: output, shape index: {}]  }
   0x1   :  { %s855_s17 = smov 0   ;;  %s857_s18 = smov 0  }
   0x2   :  { %s859_s19 = smov 0  }
   0x3 LB: > { %s36_s20 = sadd.s32 1, %s812_s17  ;;  %s40_s21 = sadd.s32 1, %s816_s18  ;;  %s820_s19 = sphi %s859_s19, %s14_s19   ;;  %s816_s18 = sphi %s857_s18, %s936_s18   ;;  %s812_s17 = sphi %s855_s17, %s935_s17   ;;  %s808_s16 = sphi %s853_s16, %s934_s16   ;;  %s804_s15 = sphi %s851_s15, %s933_s15  }
   0x4   : > { %p38_p0 = scmp.ge.s32.totalorder %s36_s20, 4  ;;  %p700_p1 = scmp.ge.s32.totalorder %s820_s19, 1 }
   0x5   : > { %p255_p2 = scmp.lt.s32.totalorder %s820_s19, 9 }
   0x6   : > { %s938_s20 = smov (%p38_p0, %s36_s20), 0  ;;  %s940_s21 = smov (!%p38_p0, %s40_s21), %s816_s18 }
   0x7   : > { %p256_p3 = pnand %p700_p1, %p255_p2  ;;  %p42_p4 = scmp.ge.s32.totalorder %s940_s21, 2 }
   0x8   : > { %p321_p5 = scmp.lt.s32.totalorder (!%p256_p3), %s808_s16, 1  ;;  %p323_p6 = scmp.lt.s32.totalorder (!%p256_p3), %s804_s15, 3 }
   0x9   : > { %s942_s21 = smov (%p42_p4, %s940_s21), 0  ;;  %259 = sbr.rel (%p256_p3) target bundleno = 800 (0x320), region = 36 }
   0xe   : > { %vm379_vm0 = vcmask 64512   ;;  %v822_v0 = vmov 0.0   ;;  %vm823_vm1 = vmmov 0   ;;  %s944_s16 = smov (!%p321_p5, %s808_s16), 1  ;;  %s946_s15 = smov (!%p323_p6, %s804_s15), 3  ;;  %vm376_vm2 = vcmask 7168  }
   0xf   : > { %718 = vmatprep.subr.bf16.mxu0 %v822_v0  ;;  %380 = vst.msk [vmem:[#allocation4] sm:$0xff] %vm379_vm0, %v822_v0  ;;  %720 = vmatprep.mubr.msk.bf16.mxu0 %vm823_vm1, %v822_v0  ;;  %s701_s22 = sshll.u32 %s944_s16, 2  ;;  %v824_v4 = vmov -inf   ;;  %s359_s7 = scalar_lea.vmem %s931_s3, %s944_s16  ;;  %v825_v13 = vmov 0   ;;  %vm475_vm3 = vcmask 1043456   ;;  %vm535_vm4 = vcmask 60416  }
  0x10   : > { %724 = vmatprep.subr.bf16.mxu1 %v822_v0  ;;  %726 = vmatprep.mubr.msk.bf16.mxu1 %vm823_vm1, %v822_v0  ;;  %s329_s23 = sadd.s32 %s701_s22, %s946_s15  ;;  %377 = vst.msk [vmem:[#allocation2] sm:$0xff] %vm376_vm2, %v824_v4  ;;  %378 = vst.msk [vmem:[#allocation3] sm:$0xff] %vm376_vm2, %v822_v0  ;;  %v710_v6 = vld [vmem:[%s359_s7] ss:$0 sm:$0xff] }
  0x11   : > { %s882_s24 = sshll.u32 %s329_s23, 2  ;;  %774 = vset.pattern.permute.xlu0 %v825_v13  ;;  %775 = vset.pattern.permute.xlu1 %v825_v13 }
  0x12   : > { %s342_s27 = scalar_lea.vmem %s929_s1, %s882_s24  ;;  %s331_s30 = scalar_lea.vmem %s928_s0, %s882_s24 }
  0x13   : > { %v382_v1 = vld [vmem:[%s342_s27] sm:$0xf]  ;;  %s353_s10 = scalar_lea.vmem %s930_s2, %s882_s24  ;;  %s370_s13 = scalar_lea.vmem %s932_s4, %s882_s24 }
  0x14   : > { %v390_v2 = vsel %vm379_vm0, %v382_v1, 0  ;;  %v381_v3 = vld [vmem:[%s331_s30] sm:$0xf] }
  0x15   : > { %719 = vmatpush3.bf16.xpose.msra.mxu0 %v390_v2  ;;  %v383_v18 = vld [vmem:[%s353_s10] sm:$0xf] }
  0x16   : > { %v477_v19 = vsel %vm475_vm3, %v383_v18, 0  ;;  %v464_v34 = vld [vmem:[#allocation4] sm:$0xff] }
  0x17   : > { %v440_v14 = vld [vmem:[#allocation2] sm:$0xff]  ;;  %725 = vmatpush3.bf16.msra.mxu1 %v477_v19  ;;  %v456_v28 = vld [vmem:[#allocation3] sm:$0xff] }
  0x1c   : > { %721 = vmatmul.mubr.msk.bf16.vlgmr.msra.gmra.mxu0 %vm379_vm0, %v381_v3 }
  0xdc   : > { %v426_v5 = vpop.f32.mrf.mxu0 }
  0xdd   : > { %v432_v7 = vmul.f32 0.35355338, %v426_v5 }
  0xde   : > { %v722_v8 = vpop.f32.mrf.mxu0 }
  0xdf   : > { %v439_v9 = vadd.f32 %v710_v6, %v432_v7 }
  0xe0   : > { %v429_v10 = vpop.f32.mrf.mxu0 }
  0xe1   : > { %v441_v11 = vsel %vm379_vm0, %v439_v9, -inf }
  0xe2   : > { %442 = vmax.xlane.f32.xlu0 %v441_v11  ;;  %v723_v12 = vpop.f32.mrf.mxu0 }
 0x16b   : > { %v443_v15 = vpop.xlane.xlu0 %442 }
 0x16c   : > { %v444_v16 = vmax.f32 %v440_v14, %v443_v15 }
 0x16e   : > { %v445_v17 = vsub.f32 %v440_v14, %v444_v16  ;;  %521 = vst.msk [vmem:[#allocation2] sm:$0xff] %vm376_vm2, %v444_v16  ;;  %450 = vperm.xlu0 %774, %v444_v16  }
 0x170   : > { %v446_v24 = vmul.f32 1.442695, %v445_v17 }
 0x1e9   : > { %v451_v20 = vpop.permute.xlu0 %450 }
 0x1ea   : > { %v453_v21 = vsub.f32 %v439_v9, %v451_v20 }
 0x1ec   : > { %v454_v22 = vmul.f32 1.442695, %v453_v21 }
 0x1ee   : > { %776 = vpow2.f32 %v454_v22 }
 0x1ef   : > { %778 = vpow2.f32 %v446_v24 }
 0x1fb   : > { %v777_v23 = vpop.eup %776 }
 0x1fc   : > { %v458_v25 = vsel %vm379_vm0, %v777_v23, 0.0  ;;  %v471_v26 = vpack.c.bf16 %v777_v23, %v777_v23  ;;  %v779_v27 = vpop.eup %778 }
 0x1fd   : > { %459 = vadd.xlane.f32.xlu1 %v458_v25  ;;  %v457_v29 = vmul.f32 %v779_v27, %v456_v28 }
 0x1fe   : > { %727 = vmatmul.mubr.msk.bf16.vlgmr.msra.gmra.mxu1 %vm379_vm0, %v471_v26 }
 0x20e   : > { %467 = vperm.xlu1 %775, %v779_v27  }
 0x286   : > { %v460_v30 = vpop.xlane.xlu1 %459 }
 0x287   : > { %v461_v31 = vadd.f32 %v460_v30, %v457_v29 }
 0x289   : > { %463 = vst.msk [vmem:[#allocation3] sm:$0xff] %vm376_vm2, %v461_v31 }
 0x28a   : > { %v468_v35 = vpop.permute.xlu1 %467 }
 0x28b   : > { %v470_v36 = vmul.f32 %v468_v35, %v464_v34 }
 0x290   : > { %v526_v32 = vld [vmem:[#allocation3] sm:$0xff] }
 0x291   : > { %780 = vrcp.f32 %v526_v32 }
 0x29e   : > { %v781_v33 = vpop.eup %780 }
 0x29f   : > { %530 = vperm.xlu1 %775, %v781_v33  }
 0x2be   : > { %v513_v37 = vpop.f32.mrf.mxu1 }
 0x2bf   : > { %v519_v38 = vadd.f32 %v513_v37, %v470_v36 }
 0x2c0   : > { %v728_v39 = vpop.f32.mrf.mxu1 }
 0x2c1   : > { %520 = vst.msk [vmem:[#allocation4] sm:$0xff] %vm379_vm0, %v519_v38 }
 0x2c2   : > { %v516_v40 = vpop.f32.mrf.mxu1 }
 0x2c4   : > { %v729_v41 = vpop.f32.mrf.mxu1 }
 0x2c8   : > { %v525_v42 = vld [vmem:[#allocation4] sm:$0xff] }
 0x31a   : > { %v531_v43 = vpop.permute.xlu1 %530 }
 0x31b   : > { %v533_v44 = vmul.f32 %v531_v43, %v525_v42 }
 0x31d   : > { %v534_v45 = vpack.c.bf16 %v533_v44, %v533_v44 }
 0x31f   : > { %536 = vst.msk [vmem:[%s370_s13] sm:$0xf] %vm535_vm4, %v534_v45 }
 0x320 PF: > { %s14_s19 = sadd.s32 1, %s820_s19   ;;  %s933_s15 = smov %s812_s17 }
 0x321   : > { %p11_p7 = scmp.ge.s32.totalorder %s14_s19, 10   ;;  %s934_s16 = smov %s816_s18 }
 0x322   : > { %s935_s17 = smov %s938_s20  ;;  %s936_s18 = smov %s942_s21 }
 0x323   :  { %13 = sbr.rel (!%p11_p7) target bundleno = 3 (0x3), region = 83 }

// kernel: _lambda_.7
= control target key start
LH: loop header
LB: loop body
LE: loop exit
PB: predicated region body
PF: predicated region fallthrough
CT: control target
= control target key end

     0   :  { %vm30_vm0 = vcmask 261120   ;;  %v222_v0 = vmov 0.0   ;;  %vm223_vm1 = vmmov 0   ;;  %vm180_vm2 = vcmask 257024   ;;  %s311_s1 = inlined_call_operand.vmem [shape: bf16[32,32], index: 1, kind: input, shape index: {}]   ;;  %s312_s0 = inlined_call_operand.vmem [shape: bf16[16,32], index: 0, kind: input, shape index: {}]   ;;  %s313_s2 = inlined_call_operand.vmem [shape: f32[1,32], index: 2, kind: input, shape index: {}]   ;;  %s314_s3 = inlined_call_operand.vmem [shape: f32[16,32], index: 3, kind: input, shape index: {}]   ;;  %s315_s4 = inlined_call_operand.vmem [shape: f32[1,32], index: 4, kind: input, shape index: {}]   ;;  %s316_s5 = inlined_call_operand.vmem [shape: f32[1,32], index: 5, kind: input, shape index: {}]   ;;  %s317_s6 = inlined_call_operand.vmem [shape: f32[16,32], index: 6, kind: output, shape index: {0}]   ;;  %s318_s7 = inlined_call_operand.vmem [shape: bf16[16,32], index: 7, kind: output, shape index: {1}]  }
   0x1   :  { %205 = vmatprep.subr.bf16.mxu0 %v222_v0  ;;  %v215_v1 = vld [vmem:[%s311_s1 + $0x8] sm:$0xff]   ;;  %209 = vmatprep.mubr.msk.bf16.mxu0 %vm223_vm1, %v222_v0  ;;  %31 = vst.msk [vmem:[#allocation2] sm:$0xff] %vm30_vm0, %v222_v0  ;;  %32 = vst.msk [vmem:[#allocation2 + $0x8] sm:$0xff] %vm30_vm0, %v222_v0  ;;  %v216_v2 = vld [vmem:[%s311_s1] sm:$0xff]  }
   0x2   :  { %206 = vmatpush3.bf16.msra.mxu0 %v215_v1  ;;  %v217_v3 = vld [vmem:[%s312_s0] sm:$0xff]   ;;  %v122_v18 = vld [vmem:[%s314_s3 + $0x8] sm:$0xff] }
   0x3   :  { %207 = vmatprep.subr.bf16.mxu0 %v222_v0  ;;  %v195_v12 = vld [vmem:[%s313_s2] ss:$0 sm:$0xff] }
   0x4   :  { %v121_v14 = vld [vmem:[%s314_s3] sm:$0xff] }
   0x5   :  { %v196_v40 = vld [vmem:[%s315_s4] ss:$0 sm:$0xff] }
   0x6   :  { %208 = vmatpush3.bf16.msra.mxu0 %v216_v2  ;;  %v197_v42 = vld [vmem:[%s316_s5] ss:$0 sm:$0xff] }
   0x8   :  { %v33_v4 = vld [vmem:[#allocation2] sm:$0xff]  ;;  %v34_v8 = vld [vmem:[#allocation2 + $0x8] sm:$0xff] }
   0x9   :  { %210 = vmatmul.mubr.msk.bf16.vlgmr.msra.gmra.mxu0 %vm30_vm0, %v217_v3 }
  0xc9   :  { %v96_v5 = vpop.f32.mrf.mxu0 }
  0xca   :  { %v103_v6 = vadd.f32 %v96_v5, %v33_v4 }
  0xcb   :  { %v211_v7 = vpop.f32.mrf.mxu0 }
  0xcc   :  { %105 = vst.msk [vmem:[#allocation2] sm:$0xff] %vm30_vm0, %v103_v6 }
  0xcd   :  { %v99_v9 = vpop.f32.mrf.mxu0 }
  0xce   :  { %v104_v10 = vadd.f32 %v99_v9, %v34_v8 }
  0xcf   :  { %v212_v11 = vpop.f32.mrf.mxu0 }
  0xd0   :  { %106 = vst.msk [vmem:[#allocation2 + $0x8] sm:$0xff] %vm30_vm0, %v104_v10 }
  0xd3   :  { %v110_v13 = vld [vmem:[#allocation2] sm:$0xff] }
  0xd4   :  { %v119_v15 = vadd.f32 %v195_v12, %v110_v13 }
  0xd6   :  { %v123_v16 = vadd.f32 %v121_v14, %v119_v15 }
  0xd7   :  { %v111_v17 = vld [vmem:[#allocation2 + $0x8] sm:$0xff] }
  0xd8   :  { %v125_v19 = vsel %vm30_vm0, %v123_v16, 0.0  ;;  %v120_v20 = vadd.f32 %v195_v12, %v111_v17 }
  0xd9   :  { %126 = vadd.xlane.f32.xlu0 %v125_v19 }
  0xda   :  { %v124_v21 = vadd.f32 %v122_v18, %v120_v20 }
  0xdc   :  { %v128_v22 = vsel %vm30_vm0, %v124_v21, 0.0 }
  0xdd   :  { %129 = vadd.xlane.f32.xlu0 %v128_v22 }
 0x162   :  { %v127_v23 = vpop.xlane.xlu0 %126 }
 0x163   :  { %v132_v24 = vmul.f32 0.03125, %v127_v23 }
 0x165   :  { %v134_v25 = vsub.f32 %v123_v16, %v132_v24 }
 0x166   :  { %v130_v26 = vpop.xlane.xlu0 %129 }
 0x167   :  { %v133_v27 = vmul.f32 0.03125, %v130_v26  ;;  %v136_v28 = vmul.f32 %v134_v25, %v134_v25 }
 0x169   :  { %v135_v29 = vsub.f32 %v124_v21, %v133_v27  ;;  %v138_v30 = vsel %vm30_vm0, %v136_v28, 0.0 }
 0x16a   :  { %139 = vadd.xlane.f32.xlu1 %v138_v30 }
 0x16b   :  { %v137_v31 = vmul.f32 %v135_v29, %v135_v29 }
 0x16d   :  { %v141_v32 = vsel %vm30_vm0, %v137_v31, 0.0 }
 0x16e   :  { %142 = vadd.xlane.f32.xlu1 %v141_v32 }
 0x1f3   :  { %v140_v33 = vpop.xlane.xlu1 %139 }
 0x1f4   :  { %v144_v34 = vmul.f32 0.03125, %v140_v33 }
 0x1f6   :  { %v146_v35 = vadd.f32 1e-12, %v144_v34 }
 0x1f7   :  { %v143_v36 = vpop.xlane.xlu1 %142 }
 0x1f8   :  { %218 = vrsqrt.f32 %v146_v35  ;;  %v145_v37 = vmul.f32 0.03125, %v143_v36 }
 0x1fa   :  { %v147_v38 = vadd.f32 1e-12, %v145_v37 }
 0x1fc   :  { %220 = vrsqrt.f32 %v147_v38 }
 0x205   :  { %v219_v39 = vpop.eup %218 }
 0x206   :  { %v150_v41 = vmul.f32 %v219_v39, %v134_v25 }
 0x208   :  { %v159_v43 = vmul.f32 %v196_v40, %v150_v41 }
 0x209   :  { %v221_v44 = vpop.eup %220 }
 0x20a   :  { %v168_v45 = vadd.f32 %v197_v42, %v159_v43  ;;  %v151_v46 = vmul.f32 %v221_v44, %v135_v29 }
 0x20c   :  { %170 = vst.msk [vmem:[%s317_s6] sm:$0xff] %vm30_vm0, %v168_v45  ;;  %v200_v47 = vpack.c.bf16 %v168_v45, %v168_v45  ;;  %v160_v48 = vmul.f32 %v196_v40, %v151_v46 }
 0x20e   :  { %181 = vst.msk [vmem:[%s318_s7] sm:$0xf] %vm180_vm2, %v200_v47  ;;  %v169_v49 = vadd.f32 %v197_v42, %v160_v48 }
 0x210   :  { %171 = vst.msk [vmem:[%s317_s6 + $0x8] sm:$0xff] %vm30_vm0, %v169_v49  ;;  %v201_v50 = vpack.c.bf16 %v169_v49, %v169_v49 }
 0x212   :  { %182 = vst.msk [vmem:[%s318_s7 + $0x4] sm:$0xf] %vm180_vm2, %v201_v50 }

// kernel: _lambda_.8
= control target key start
LH: loop header
LB: loop body
LE: loop exit
PB: predicated region body
PF: predicated region fallthrough
CT: control target
= control target key end

     0   :  { %v215_v0 = vmov 0.0   ;;  %vm216_vm0 = vmmov 0   ;;  %vm46_vm1 = vcmask 261120   ;;  %s252_s1 = inlined_call_operand.vmem [shape: bf16[32,128], index: 1, kind: input, shape index: {}]   ;;  %s253_s0 = inlined_call_operand.vmem [shape: bf16[16,32], index: 0, kind: input, shape index: {}]   ;;  %s254_s2 = inlined_call_operand.vmem [shape: f32[1,128], index: 2, kind: input, shape index: {}]   ;;  %s255_s3 = inlined_call_operand.vmem [shape: bf16[16,128], index: 3, kind: output, shape index: {}]  }
   0x1   :  { %194 = vmatprep.subr.bf16.mxu0 %v215_v0  ;;  %v204_v1 = vld [vmem:[%s252_s1 + $0x8] sm:$0xff]   ;;  %198 = vmatprep.mubr.msk.bf16.mxu0 %vm216_vm0, %v215_v0  ;;  %v205_v2 = vld [vmem:[%s252_s1] sm:$0xff]  }
   0x2   :  { %195 = vmatpush3.bf16.msra.mxu0 %v204_v1  ;;  %v206_v3 = vld [vmem:[%s253_s0] sm:$0xff]  }
   0x3   :  { %196 = vmatprep.subr.bf16.mxu0 %v215_v0  ;;  %v181_v4 = vld [vmem:[%s254_s2] ss:$0 sm:$0xff] }
   0x6   :  { %197 = vmatpush3.bf16.msra.mxu0 %v205_v2 }
   0x9   :  { %199 = vmatmul.mubr.msk.bf16.vlgmr.msra.gmra.mxu0 %vm46_vm1, %v206_v3 }
  0xc9   :  { %v84_v5 = vpop.f32.mrf.mxu0 }
  0xca   :  { %v107_v6 = vadd.f32 %v181_v4, %v84_v5 }
  0xcb   :  { %v200_v7 = vpop.f32.mrf.mxu0 }
  0xcc   :  { %v109_v8 = vmul.f32 0.70710856, %v107_v6  ;;  %v157_v56 = vmul.f32 0.5, %v107_v6 }
  0xcd   :  { %v87_v9 = vpop.f32.mrf.mxu0 }
  0xce   :  { %v111_v10 = vand.u32 2147483647, %v109_v8  ;;  %v108_v11 = vadd.f32 %v181_v4, %v87_v9  ;;  %vm151_vm2 = vcmp.lt.f32.partialorder %v109_v8, 0.0 }
  0xcf   :  { %v201_v12 = vpop.f32.mrf.mxu0 }
  0xd0   :  { %v113_v13 = vmul.f32 0.3275911, %v111_v10  ;;  %v110_v14 = vmul.f32 0.70710856, %v108_v11  ;;  %v139_v19 = vsub.f32 0.0, %v111_v10  ;;  %v158_v57 = vmul.f32 0.5, %v108_v11 }
  0xd2   :  { %v115_v15 = vadd.f32 1.0, %v113_v13  ;;  %v112_v16 = vand.u32 2147483647, %v110_v14  ;;  %v141_v20 = vmul.f32 %v139_v19, %v111_v10  ;;  %vm152_vm3 = vcmp.lt.f32.partialorder %v110_v14, 0.0 }
  0xd4   :  { %207 = vrcp.f32 %v115_v15  ;;  %v114_v17 = vmul.f32 0.3275911, %v112_v16  ;;  %v140_v21 = vsub.f32 0.0, %v112_v16  ;;  %v143_v24 = vmul.f32 1.442695, %v141_v20 }
  0xd6   :  { %v116_v18 = vadd.f32 1.0, %v114_v17  ;;  %v142_v25 = vmul.f32 %v140_v21, %v112_v16 }
  0xd8   :  { %209 = vrcp.f32 %v116_v18  ;;  %v145_v30 = vmul.f32 1.442695, %v142_v25 }
  0xd9   :  { %211 = vpow2.f32 %v143_v24 }
  0xda   :  { %213 = vpow2.f32 %v145_v30 }
  0xe1   :  { %v208_v22 = vpop.eup %207 }
  0xe2   :  { %v121_v23 = vmul.f32 1.0614054, %v208_v22 }
  0xe4   :  { %v123_v26 = vadd.f32 -1.4531521, %v121_v23 }
  0xe5   :  { %v210_v27 = vpop.eup %209 }
  0xe6   :  { %v125_v28 = vmul.f32 %v208_v22, %v123_v26  ;;  %v122_v29 = vmul.f32 1.0614054, %v210_v27  ;;  %v212_v43 = vpop.eup %211 }
  0xe7   :  { %v214_v48 = vpop.eup %213 }
  0xe8   :  { %v127_v31 = vadd.f32 1.4214138, %v125_v28  ;;  %v124_v32 = vadd.f32 -1.4531521, %v122_v29 }
  0xea   :  { %v129_v33 = vmul.f32 %v208_v22, %v127_v31  ;;  %v126_v34 = vmul.f32 %v210_v27, %v124_v32 }
  0xec   :  { %v131_v35 = vadd.f32 -0.28449672, %v129_v33  ;;  %v128_v36 = vadd.f32 1.4214138, %v126_v34 }
  0xee   :  { %v133_v37 = vmul.f32 %v208_v22, %v131_v35  ;;  %v130_v38 = vmul.f32 %v210_v27, %v128_v36 }
  0xf0   :  { %v135_v39 = vadd.f32 0.2548296, %v133_v37  ;;  %v132_v40 = vadd.f32 -0.28449672, %v130_v38 }
  0xf2   :  { %v137_v41 = vmul.f32 %v208_v22, %v135_v39  ;;  %v134_v42 = vmul.f32 %v210_v27, %v132_v40 }
  0xf4   :  { %v147_v44 = vmul.f32 %v212_v43, %v137_v41  ;;  %v136_v45 = vadd.f32 0.2548296, %v134_v42 }
  0xf6   :  { %v149_v46 = vsub.f32 1.0, %v147_v44  ;;  %v138_v47 = vmul.f32 %v210_v27, %v136_v45 }
  0xf8   :  { %v153_v49 = vsub.f32 0.0, %v149_v46  ;;  %v148_v50 = vmul.f32 %v214_v48, %v138_v47 }
  0xfa   :  { %v155_v51 = vsel %vm151_vm2, %v153_v49, %v149_v46  ;;  %v150_v52 = vsub.f32 1.0, %v148_v50 }
  0xfb   :  { %v159_v54 = vadd.f32 1.0, %v155_v51 }
  0xfc   :  { %v154_v53 = vsub.f32 0.0, %v150_v52 }
  0xfd   :  { %v161_v59 = vmul.f32 %v159_v54, %v157_v56 }
  0xfe   :  { %v156_v55 = vsel %vm152_vm3, %v154_v53, %v150_v52 }
  0xff   :  { %v160_v58 = vadd.f32 1.0, %v156_v55 }
 0x101   :  { %v162_v60 = vmul.f32 %v160_v58, %v158_v57 }
 0x103   :  { %v189_v61 = vpack.c.bf16 %v162_v60, %v161_v59 }
 0x105   :  { %190 = vst [vmem:[%s255_s3] sm:$0xff] %v189_v61  }

// kernel: _lambda_.9
= control target key start
LH: loop header
LB: loop body
LE: loop exit
PB: predicated region body
PF: predicated region fallthrough
CT: control target
= control target key end

     0   :  { %v314_v1 = vmov 0.0   ;;  %vm315_vm0 = vmmov 0   ;;  %vm29_vm1 = vcmask 261120   ;;  %s409_s0 = inlined_call_operand.vmem [shape: bf16[16,128], index: 0, kind: input, shape index: {}]   ;;  %s410_s1 = inlined_call_operand.vmem [shape: bf16[128,32], index: 1, kind: input, shape index: {}]   ;;  %s411_s2 = inlined_call_operand.vmem [shape: f32[1,32], index: 2, kind: input, shape index: {}]   ;;  %s412_s3 = inlined_call_operand.vmem [shape: f32[16,32], index: 3, kind: input, shape index: {}]   ;;  %s413_s4 = inlined_call_operand.vmem [shape: f32[1,32], index: 4, kind: input, shape index: {}]   ;;  %s414_s5 = inlined_call_operand.vmem [shape: f32[1,32], index: 5, kind: input, shape index: {}]   ;;  %s415_s6 = inlined_call_operand.hbm [shape: f32[16,32], index: 6, kind: output, shape index: {}]  }
   0x1   :  { %v279_v0 = vld [vmem:[%s410_s1 + $0x38] sm:$0xff]   ;;  %254 = vmatprep.subr.bf16.mxu0 %v314_v1  ;;  %v280_v2 = vld [vmem:[%s410_s1 + $0x30] sm:$0xff]   ;;  %270 = vmatprep.mubr.msk.bf16.mxu0 %vm315_vm0, %v314_v1  ;;  %30 = vst.msk [vmem:[#allocation2] sm:$0xff] %vm29_vm1, %v314_v1  ;;  %31 = vst.msk [vmem:[#allocation2 + $0x8] sm:$0xff] %vm29_vm1, %v314_v1 }
   0x2   :  { %255 = vmatpush3.bf16.msra.mxu0 %v279_v0  ;;  %v281_v3 = vld [vmem:[%s410_s1 + $0x28] sm:$0xff]  }
   0x3   :  { %256 = vmatprep.subr.bf16.mxu0 %v314_v1 }
   0x6   :  { %257 = vmatpush3.bf16.msra.mxu0 %v280_v2 }
   0x7   :  { %258 = vmatprep.subr.bf16.mxu0 %v314_v1 }
   0x8   :  { %11 = vsyncpa [#allocation4], 0  ;;  %v282_v4 = vld [vmem:[%s410_s1 + $0x20] sm:$0xff]   ;;  %v283_v5 = vld [vmem:[%s410_s1 + $0x18] sm:$0xff]   ;;  %s316_s21 = smov [#allocation3]  }
   0x9   :  { %v284_v6 = vld [vmem:[%s410_s1 + $0x10] sm:$0xff]   ;;  %v285_v7 = vld [vmem:[%s410_s1 + $0x8] sm:$0xff]   ;;  %v286_v8 = vld [vmem:[%s410_s1] sm:$0xff]   ;;  %s222_s22 = sshll.u32 %s316_s21, 4  ;;  %s223_s22 = int_to_ptr.vmem [resolvable:$true] %s222_s22 }
   0xa   :  { %259 = vmatpush3.bf16.msra.mxu0 %v281_v3  ;;  %v287_v9 = vld [vmem:[%s409_s0] sm:$0xff]   ;;  %v33_v14 = vld [vmem:[#allocation2 + $0x8] sm:$0xff]  ;;  %s292_s23 = scalar_lea.vmem %s223_s22, 256  ;;  %p297_p1 = scmp.lt.s32.totalorder %s223_s22, %s223_s22 }
   0xb   :  { %260 = vmatprep.subr.bf16.mxu0 %v314_v1  ;;  %v32_v10 = vld [vmem:[#allocation2] sm:$0xff]  ;;  %v167_v24 = vld [vmem:[%s412_s3 + $0x8] sm:$0xff]  ;;  %p293_p0 = scmp.ne.s32.totalorder %s223_s22, %s292_s23  ;;  %p298_p2 = scmp.lt.s32.totalorder %s292_s23, %s292_s23 }
   0xc   :  { %v242_v18 = vld [vmem:[%s411_s2] ss:$0 sm:$0xff] }
   0xd   :  { %v166_v20 = vld [vmem:[%s412_s3] sm:$0xff]  ;;  %p299_p3 = por %p298_p2, %p297_p1 }
   0xe   :  { %261 = vmatpush3.bf16.msra.mxu0 %v282_v4  ;;  %v243_v46 = vld [vmem:[%s413_s4] ss:$0 sm:$0xff] }
   0xf   :  { %262 = vmatprep.subr.bf16.mxu0 %v314_v1  ;;  %v244_v48 = vld [vmem:[%s414_s5] ss:$0 sm:$0xff]  ;;  %p300_p4 = pnand %p299_p3, %p293_p0 }
  0x12   :  { %263 = vmatpush3.bf16.msra.mxu0 %v283_v5 }
  0x13   :  { %264 = vmatprep.subr.bf16.mxu0 %v314_v1 }
  0x16   :  { %265 = vmatpush3.bf16.msra.mxu0 %v284_v6 }
  0x17   :  { %266 = vmatprep.subr.bf16.mxu0 %v314_v1 }
  0x1a   :  { %267 = vmatpush3.bf16.msra.mxu0 %v285_v7 }
  0x1b   :  { %268 = vmatprep.subr.bf16.mxu0 %v314_v1 }
  0x1e   :  { %269 = vmatpush3.bf16.msra.mxu0 %v286_v8 }
  0x21   :  { %271 = vmatmul.mubr.bf16.vlgmr.msra.gmra.mxu0 %v287_v9 }
  0xe1   :  { %v140_v11 = vpop.f32.mrf.mxu0 }
  0xe2   :  { %v147_v12 = vadd.f32 %v140_v11, %v32_v10 }
  0xe3   :  { %v272_v13 = vpop.f32.mrf.mxu0 }
  0xe4   :  { %150 = vst.msk [vmem:[#allocation2] sm:$0xff] %vm29_vm1, %v147_v12 }
  0xe5   :  { %v143_v15 = vpop.f32.mrf.mxu0 }
  0xe6   :  { %v148_v16 = vadd.f32 %v143_v15, %v33_v14 }
  0xe7   :  { %v273_v17 = vpop.f32.mrf.mxu0 }
  0xe8   :  { %151 = vst.msk [vmem:[#allocation2 + $0x8] sm:$0xff] %vm29_vm1, %v148_v16 }
  0xeb   :  { %v155_v19 = vld [vmem:[#allocation2] sm:$0xff] }
  0xec   :  { %v164_v21 = vadd.f32 %v242_v18, %v155_v19 }
  0xee   :  { %v168_v22 = vadd.f32 %v166_v20, %v164_v21 }
  0xef   :  { %v156_v23 = vld [vmem:[#allocation2 + $0x8] sm:$0xff] }
  0xf0   :  { %v170_v25 = vsel %vm29_vm1, %v168_v22, 0.0  ;;  %v165_v26 = vadd.f32 %v242_v18, %v156_v23 }
  0xf1   :  { %171 = vadd.xlane.f32.xlu0 %v170_v25 }
  0xf2   :  { %v169_v27 = vadd.f32 %v167_v24, %v165_v26 }
  0xf4   :  { %v173_v28 = vsel %vm29_vm1, %v169_v27, 0.0 }
  0xf5   :  { %174 = vadd.xlane.f32.xlu0 %v173_v28 }
 0x17a   :  { %v172_v29 = vpop.xlane.xlu0 %171 }
 0x17b   :  { %v177_v30 = vmul.f32 0.03125, %v172_v29 }
 0x17d   :  { %v179_v31 = vsub.f32 %v168_v22, %v177_v30 }
 0x17e   :  { %v175_v32 = vpop.xlane.xlu0 %174 }
 0x17f   :  { %v178_v33 = vmul.f32 0.03125, %v175_v32  ;;  %v181_v34 = vmul.f32 %v179_v31, %v179_v31 }
 0x181   :  { %v180_v35 = vsub.f32 %v169_v27, %v178_v33  ;;  %v183_v36 = vsel %vm29_vm1, %v181_v34, 0.0 }
 0x182   :  { %184 = vadd.xlane.f32.xlu1 %v183_v36 }
 0x183   :  { %v182_v37 = vmul.f32 %v180_v35, %v180_v35 }
 0x185   :  { %v186_v38 = vsel %vm29_vm1, %v182_v37, 0.0 }
 0x186   :  { %187 = vadd.xlane.f32.xlu1 %v186_v38 }
 0x20b   :  { %v185_v39 = vpop.xlane.xlu1 %184 }
 0x20c   :  { %v189_v40 = vmul.f32 0.03125, %v185_v39 }
 0x20e   :  { %v191_v41 = vadd.f32 1e-12, %v189_v40 }
 0x20f   :  { %v188_v42 = vpop.xlane.xlu1 %187 }
 0x210   :  { %288 = vrsqrt.f32 %v191_v41  ;;  %v190_v43 = vmul.f32 0.03125, %v188_v42 }
 0x212   :  { %v192_v44 = vadd.f32 1e-12, %v190_v43 }
 0x214   :  { %290 = vrsqrt.f32 %v192_v44 }
 0x21d   :  { %v289_v45 = vpop.eup %288 }
 0x21e   :  { %v195_v47 = vmul.f32 %v289_v45, %v179_v31 }
 0x220   :  { %v204_v49 = vmul.f32 %v243_v46, %v195_v47 }
 0x221   :  { %v291_v50 = vpop.eup %290 }
 0x222   :  { %v196_v51 = vmul.f32 %v291_v50, %v180_v35  ;;  %v213_v52 = vadd.f32 %v244_v48, %v204_v49 }
 0x224   :  { %v205_v53 = vmul.f32 %v243_v46, %v196_v51  ;;  %215 = vst.msk [vmem:[#allocation3] sm:$0xff] %vm29_vm1, %v213_v52 }
 0x226   :  { %v214_v54 = vadd.f32 %v244_v48, %v205_v53 }
 0x228   :  { %216 = vst.msk [vmem:[#allocation3 + $0x8] sm:$0xff] %vm29_vm1, %v214_v54 }
 0x229   :  { %303 = shalt.err (!%p300_p4)
}
 0x22a   :  { %s317_s4 = smov 128   ;;  %s318_s5 = smov 8  }
 0x22b   :  { %228 = dma.vmem_to_hbm [thread:$0]  %s223_s22, 256, %s415_s6, [#allocation4], %s317_s4, %s317_s4, %s318_s5  }
 0x22c   :  { %312 = dma.done.wait [#allocation4], 256  }
 0x22d   :  { %313 = vsyncadd [#allocation4], 4294967040 }
 0x22e   :  { %232 = vsyncpa [#allocation4], 1 }

</bundles_post_ra>
